<compile_context>
chip_gen: v6e
topology: v6e:2x2x1
jax: 0.10.0
libtpu: 0.0.40
codegen_flags: <defaults>
</compile_context>

<pallas_src>
import functools
import math

import jax
import jax.numpy as jnp
from jax.experimental import pallas as pl
from jax.experimental.pallas import tpu as pltpu

LN_EPS = 1e-5


# ---------------- in-kernel math helpers -------------------------------------
def _gelu(x):
    # TODO(synk): PyTorch nn.GELU() default is the exact erf form; the tanh
    # approximation is used since it has a guaranteed Mosaic lowering.
    c = math.sqrt(2.0 / math.pi)
    return 0.5 * x * (1.0 + jnp.tanh(c * (x + 0.044715 * x * x * x)))


def _layernorm(x, gamma, beta):
    mean = jnp.mean(x, axis=-1, keepdims=True)
    var = jnp.mean(jnp.square(x - mean), axis=-1, keepdims=True)
    return (x - mean) * jax.lax.rsqrt(var + LN_EPS) * gamma + beta


# ---------------- fused BERTBlock kernel --------------------------------------
def _bert_block_kernel(x_ref, m_ref, wqkv_ref, wo_ref, bo_ref,
                       g1_ref, be1_ref, w1_ref, b1_ref, w2_ref, b2_ref,
                       g2_ref, be2_ref, o_ref, *, num_heads):
    # One batch element per grid step; everything stays in VMEM.
    x = x_ref[0]                            # [S, D]
    msk = m_ref[...]                        # [1, 1, S]  (1.0 = valid, 0.0 = pad)
    s_len, d_model = x.shape
    d_k = d_model // num_heads
    scale = 1.0 / math.sqrt(d_k)

    # Fused QKV projection: a single MXU matmul.
    qkv = jnp.dot(x, wqkv_ref[...], preferred_element_type=jnp.float32)  # [S, 3D]

    def heads(t):                            # [S, D] -> [H, S, D_K]
        return jnp.swapaxes(t.reshape(s_len, num_heads, d_k), 0, 1)

    q = heads(qkv[:, 0:d_model])
    k = heads(qkv[:, d_model:2 * d_model])
    v = heads(qkv[:, 2 * d_model:3 * d_model])

    # Head-batched attention scores: [H, Sq, Sk].
    s = jnp.einsum("hqd,hkd->hqk", q, k,
                   preferred_element_type=jnp.float32) * scale
    s = jnp.where(msk != 0.0, s, -1000000000.0)       # masked_fill on key axis

    # Softmax with the divide pushed onto the EUP via approx reciprocal.
    m = jnp.max(s, axis=-1, keepdims=True)
    e = jnp.exp(s - m)
    p = e * pl.reciprocal(jnp.sum(e, axis=-1, keepdims=True), approx=True)

    attn = jnp.einsum("hqk,hkd->hqd", p, v,
                      preferred_element_type=jnp.float32)    # [H, S, D_K]
    attn = jnp.swapaxes(attn, 0, 1).reshape(s_len, d_model)  # [S, D]

    out = jnp.dot(attn, wo_ref[...],
                  preferred_element_type=jnp.float32) + bo_ref[...]
    h1 = _layernorm(x + out, g1_ref[...], be1_ref[...])      # attention LN

    ff = _gelu(jnp.dot(h1, w1_ref[...],
                       preferred_element_type=jnp.float32) + b1_ref[...])
    ff = jnp.dot(ff, w2_ref[...],
                 preferred_element_type=jnp.float32) + b2_ref[...]
    o_ref[0] = _layernorm(h1 + ff, g2_ref[...], be2_ref[...])  # block LN


def bert_block(x, mask, p, *, num_heads):
    """Fused BERTBlock forward. x: [B,S,D] f32, mask: [B,1,S] (1=valid)."""
    B, S, D = x.shape
    F = p["w1"].shape[1]

    def full(shape):
        return pl.BlockSpec(shape, lambda b, _s=shape: (0,) * len(_s))

    return pl.pallas_call(
        functools.partial(_bert_block_kernel, num_heads=num_heads),
        grid=(B,),
        in_specs=[
            pl.BlockSpec((1, S, D), lambda b: (b, 0, 0)),    # x (per-batch tile)
            pl.BlockSpec((1, 1, S), lambda b: (b, 0, 0)),    # key-padding mask
            full((D, 3 * D)), full((D, D)), full((1, D)),    # wqkv, wo, bo
            full((1, D)), full((1, D)),                      # attn LN gamma/beta
            full((D, F)), full((1, F)),                      # ffn w1 / b1
            full((F, D)), full((1, D)),                      # ffn w2 / b2
            full((1, D)), full((1, D)),                      # block LN gamma/beta
        ],
        out_specs=pl.BlockSpec((1, S, D), lambda b: (b, 0, 0)),
        out_shape=jax.ShapeDtypeStruct((B, S, D), jnp.float32),
        compiler_params=pltpu.CompilerParams(
            dimension_semantics=("parallel",)),   # batch shards over v7x's 2 TCs
    )(x, mask, p["wqkv"], p["wo"], p["bo"], p["ln1_g"], p["ln1_b"],
      p["w1"], p["b1"], p["w2"], p["b2"], p["ln2_g"], p["ln2_b"])


# ---------------- pure-JAX reference (for sanity checking) --------------------
def bert_block_ref(x, mask, p, *, num_heads):
    B, S, D = x.shape
    d_k = D // num_heads
    hp = jax.lax.Precision.HIGHEST
    qkv = jnp.dot(x, p["wqkv"], precision=hp)
    q, k, v = jnp.split(qkv, 3, axis=-1)

    def heads(t):
        return jnp.swapaxes(t.reshape(B, S, num_heads, d_k), 1, 2)

    q, k, v = heads(q), heads(k), heads(v)
    s = jnp.einsum("bhqd,bhkd->bhqk", q, k, precision=hp) / math.sqrt(d_k)
    s = jnp.where(mask[:, None, :, :] != 0.0, s, -1000000000.0)
    w = jax.nn.softmax(s, axis=-1)
    attn = jnp.einsum("bhqk,bhkd->bhqd", w, v, precision=hp)
    attn = jnp.swapaxes(attn, 1, 2).reshape(B, S, D)
    out = jnp.dot(attn, p["wo"], precision=hp) + p["bo"]
    h1 = _layernorm(x + out, p["ln1_g"], p["ln1_b"])
    ff = _gelu(jnp.dot(h1, p["w1"], precision=hp) + p["b1"])
    ff = jnp.dot(ff, p["w2"], precision=hp) + p["b2"]
    return _layernorm(h1 + ff, p["ln2_g"], p["ln2_b"])


# ---------------- deterministic parameter init --------------------------------
def init_params(key, d_model, num_heads, d_ff):
    del num_heads  # shapes do not depend on it
    ks = jax.random.split(key, 6)

    def xavier(k, shape):
        lim = math.sqrt(6.0 / (shape[0] + shape[1]))
        return jax.random.uniform(k, shape, jnp.float32, -lim, lim)

    wq = xavier(ks[0], (d_model, d_model))
    wk = xavier(ks[1], (d_model, d_model))
    wv = xavier(ks[2], (d_model, d_model))
    # NOTE: for scaled configs store dense weights in bf16 (f32 accumulation);
    # kept f32 here since the toy model is dispatch/latency bound, not DMA bound.
    return {
        "wqkv": jnp.concatenate([wq, wk, wv], axis=1),   # fused QKV [D, 3D]
        "wo": xavier(ks[3], (d_model, d_model)),
        "bo": jnp.zeros((1, d_model), jnp.float32),
        "ln1_g": jnp.ones((1, d_model), jnp.float32),
        "ln1_b": jnp.zeros((1, d_model), jnp.float32),
        "w1": 0.02 * jax.random.normal(ks[4], (d_model, d_ff), jnp.float32),
        "b1": jnp.zeros((1, d_ff), jnp.float32),
        "w2": 0.02 * jax.random.normal(ks[5], (d_ff, d_model), jnp.float32),
        "b2": jnp.zeros((1, d_model), jnp.float32),
        "ln2_g": jnp.ones((1, d_model), jnp.float32),
        "ln2_b": jnp.zeros((1, d_model), jnp.float32),
    }


if __name__ == "__main__":
    B, S, D_MODEL, NUM_HEADS, D_FF = 2, 16, 128, 4, 256

    key = jax.random.PRNGKey(0)
    kp, kx = jax.random.split(key)
    params = init_params(kp, D_MODEL, NUM_HEADS, D_FF)

    x = jax.random.normal(kx, (B, S, D_MODEL), jnp.float32)
    mask = jnp.ones((B, 1, S), jnp.float32)
    mask = mask.at[0, 0, S - 3:].set(0.0)    # a few padded key positions

    y = bert_block(x, mask, params, num_heads=NUM_HEADS)
    jax.block_until_ready(y)

    y_ref = bert_block_ref(x, mask, params, num_heads=NUM_HEADS)
    assert y.shape == (B, S, D_MODEL)
    assert bool(jnp.all(jnp.isfinite(y)))
    max_err = float(jnp.max(jnp.abs(y - y_ref)))
    assert max_err < 3e-2, f"mismatch vs reference: max abs err {max_err}"
    print("KERNEL_OK")
</pallas_src>

<mosaic_0001>
module attributes {stable_mosaic.version = 11 : i64} {
  func.func @_bert_block_kernel(%arg0: i32, %arg1: memref<1x16x128xf32, #tpu.memory_space<vmem>>, %arg2: memref<1x1x16xf32, #tpu.memory_space<vmem>>, %arg3: memref<128x384xf32, #tpu.memory_space<vmem>>, %arg4: memref<128x128xf32, #tpu.memory_space<vmem>>, %arg5: memref<1x128xf32, #tpu.memory_space<vmem>>, %arg6: memref<1x128xf32, #tpu.memory_space<vmem>>, %arg7: memref<1x128xf32, #tpu.memory_space<vmem>>, %arg8: memref<128x256xf32, #tpu.memory_space<vmem>>, %arg9: memref<1x256xf32, #tpu.memory_space<vmem>>, %arg10: memref<256x128xf32, #tpu.memory_space<vmem>>, %arg11: memref<1x128xf32, #tpu.memory_space<vmem>>, %arg12: memref<1x128xf32, #tpu.memory_space<vmem>>, %arg13: memref<1x128xf32, #tpu.memory_space<vmem>>, %arg14: memref<1x16x128xf32, #tpu.memory_space<vmem>>) attributes {dimension_semantics = [#tpu.dimension_semantics<parallel>], iteration_bounds = array<i64: 2>, scalar_prefetch = 0 : i64, scratch_operands = 0 : i64, tpu.core_type = #tpu.core_type<tc>, window_params = [{transform_indices = @transform_0, window_bounds = array<i64: 1, 16, 128>}, {transform_indices = @transform_1, window_bounds = array<i64: 1, 1, 16>}, {pipeline_mode = #tpu.pipeline_mode<synchronous>, transform_indices = @transform_2, window_bounds = array<i64: 128, 384>}, {pipeline_mode = #tpu.pipeline_mode<synchronous>, transform_indices = @transform_3, window_bounds = array<i64: 128, 128>}, {pipeline_mode = #tpu.pipeline_mode<synchronous>, transform_indices = @transform_4, window_bounds = array<i64: 1, 128>}, {pipeline_mode = #tpu.pipeline_mode<synchronous>, transform_indices = @transform_5, window_bounds = array<i64: 1, 128>}, {pipeline_mode = #tpu.pipeline_mode<synchronous>, transform_indices = @transform_6, window_bounds = array<i64: 1, 128>}, {pipeline_mode = #tpu.pipeline_mode<synchronous>, transform_indices = @transform_7, window_bounds = array<i64: 128, 256>}, {pipeline_mode = #tpu.pipeline_mode<synchronous>, transform_indices = @transform_8, window_bounds = array<i64: 1, 256>}, {pipeline_mode = #tpu.pipeline_mode<synchronous>, transform_indices = @transform_9, window_bounds = array<i64: 256, 128>}, {pipeline_mode = #tpu.pipeline_mode<synchronous>, transform_indices = @transform_10, window_bounds = array<i64: 1, 128>}, {pipeline_mode = #tpu.pipeline_mode<synchronous>, transform_indices = @transform_11, window_bounds = array<i64: 1, 128>}, {pipeline_mode = #tpu.pipeline_mode<synchronous>, transform_indices = @transform_12, window_bounds = array<i64: 1, 128>}, {transform_indices = @transform_13, window_bounds = array<i64: 1, 16, 128>}]} {
    %c0 = arith.constant 0 : index
    %c0_0 = arith.constant 0 : index
    %c0_1 = arith.constant 0 : index
    %0 = vector.load %arg1[%c0, %c0_0, %c0_1] : memref<1x16x128xf32, #tpu.memory_space<vmem>>, vector<1x16x128xf32>
    %1 = vector.shape_cast %0 : vector<1x16x128xf32> to vector<16x128xf32>
    %c0_2 = arith.constant 0 : index
    %c0_3 = arith.constant 0 : index
    %c0_4 = arith.constant 0 : index
    %2 = vector.load %arg2[%c0_2, %c0_3, %c0_4] : memref<1x1x16xf32, #tpu.memory_space<vmem>>, vector<1x1x16xf32>
    %c0_5 = arith.constant 0 : index
    %c0_6 = arith.constant 0 : index
    %3 = vector.load %arg3[%c0_5, %c0_6] : memref<128x384xf32, #tpu.memory_space<vmem>>, vector<128x384xf32>
    %cst = arith.constant dense<0.000000e+00> : vector<16x384xf32>
    %4 = tpu.matmul %1, %3, %cst {dimension_numbers = #tpu.dot_dimension_numbers<[1], [0], [0], [1], [0, 0, 1, 1], [], []>} : vector<16x128xf32>, vector<128x384xf32>, vector<16x384xf32> -> vector<16x384xf32>
    %5 = vector.extract_strided_slice %4 {offsets = [0, 0], sizes = [16, 128], strides = [1, 1]} : vector<16x384xf32> to vector<16x128xf32>
    %6 = vector.shape_cast %5 : vector<16x128xf32> to vector<16x4x32xf32>
    %7 = tpu.transpose %6, [1, 0, 2] : vector<16x4x32xf32> -> vector<4x16x32xf32>
    %8 = vector.extract_strided_slice %4 {offsets = [0, 128], sizes = [16, 128], strides = [1, 1]} : vector<16x384xf32> to vector<16x128xf32>
    %9 = vector.shape_cast %8 : vector<16x128xf32> to vector<16x4x32xf32>
    %10 = tpu.transpose %9, [1, 0, 2] : vector<16x4x32xf32> -> vector<4x16x32xf32>
    %11 = vector.extract_strided_slice %4 {offsets = [0, 256], sizes = [16, 128], strides = [1, 1]} : vector<16x384xf32> to vector<16x128xf32>
    %12 = vector.shape_cast %11 : vector<16x128xf32> to vector<16x4x32xf32>
    %13 = tpu.transpose %12, [1, 0, 2] : vector<16x4x32xf32> -> vector<4x16x32xf32>
    "tpu.trace_start"() <{level = 10 : i32, message = "hqd,hkd->hqk"}> : () -> ()
    %cst_7 = arith.constant dense<0.000000e+00> : vector<4x16x16xf32>
    %14 = tpu.matmul %7, %10, %cst_7 {dimension_numbers = #tpu.dot_dimension_numbers<[2], [2], [1], [1], [0, 0, 0, 1, 1, 1], [0], [0]>} : vector<4x16x32xf32>, vector<4x16x32xf32>, vector<4x16x16xf32> -> vector<4x16x16xf32>
    "tpu.trace_stop"() : () -> ()
    %cst_8 = arith.constant 0.176776692 : f32
    %15 = vector.broadcast %cst_8 : f32 to vector<4x16x16xf32>
    %16 = arith.mulf %14, %15 : vector<4x16x16xf32>
    %cst_9 = arith.constant 0.000000e+00 : f32
    %17 = vector.broadcast %cst_9 : f32 to vector<1x1x16xf32>
    %18 = arith.cmpf one, %2, %17 : vector<1x1x16xf32>
    %cst_10 = arith.constant -1.000000e+09 : f32
    %19 = vector.shape_cast %18 : vector<1x1x16xi1> to vector<1x1x16xi1>
    %20 = vector.broadcast %19 : vector<1x1x16xi1> to vector<4x16x16xi1>
    %21 = vector.broadcast %cst_10 : f32 to vector<4x16x16xf32>
    %22 = arith.select %20, %16, %21 : vector<4x16x16xi1>, vector<4x16x16xf32>
    %cst_11 = arith.constant dense<0xFF800000> : vector<4x16xf32>
    %23 = vector.multi_reduction <maximumf>, %22, %cst_11 [2] : vector<4x16x16xf32> to vector<4x16xf32>
    %24 = vector.shape_cast %23 : vector<4x16xf32> to vector<4x16x1xf32>
    %25 = vector.broadcast %24 : vector<4x16x1xf32> to vector<4x16x16xf32>
    %26 = arith.subf %22, %25 : vector<4x16x16xf32>
    %27 = math.exp %26 : vector<4x16x16xf32>
    %cst_12 = arith.constant dense<0.000000e+00> : vector<4x16xf32>
    %28 = vector.multi_reduction <add>, %27, %cst_12 [2] : vector<4x16x16xf32> to vector<4x16xf32>
    %29 = vector.shape_cast %28 : vector<4x16xf32> to vector<4x16x1xf32>
    %30 = tpu.reciprocal %29 {approx = true} : vector<4x16x1xf32> -> vector<4x16x1xf32>
    %31 = vector.broadcast %30 : vector<4x16x1xf32> to vector<4x16x16xf32>
    %32 = arith.mulf %27, %31 : vector<4x16x16xf32>
    "tpu.trace_start"() <{level = 10 : i32, message = "hqk,hkd->hqd"}> : () -> ()
    %cst_13 = arith.constant dense<0.000000e+00> : vector<4x16x32xf32>
    %33 = tpu.matmul %32, %13, %cst_13 {dimension_numbers = #tpu.dot_dimension_numbers<[2], [1], [1], [2], [0, 0, 0, 1, 1, 2], [0], [0]>} : vector<4x16x16xf32>, vector<4x16x32xf32>, vector<4x16x32xf32> -> vector<4x16x32xf32>
    "tpu.trace_stop"() : () -> ()
    %34 = tpu.transpose %33, [1, 0, 2] : vector<4x16x32xf32> -> vector<16x4x32xf32>
    %35 = vector.shape_cast %34 : vector<16x4x32xf32> to vector<16x128xf32>
    %c0_14 = arith.constant 0 : index
    %c0_15 = arith.constant 0 : index
    %36 = vector.load %arg4[%c0_14, %c0_15] : memref<128x128xf32, #tpu.memory_space<vmem>>, vector<128x128xf32>
    %cst_16 = arith.constant dense<0.000000e+00> : vector<16x128xf32>
    %37 = tpu.matmul %35, %36, %cst_16 {dimension_numbers = #tpu.dot_dimension_numbers<[1], [0], [0], [1], [0, 0, 1, 1], [], []>} : vector<16x128xf32>, vector<128x128xf32>, vector<16x128xf32> -> vector<16x128xf32>
    %c0_17 = arith.constant 0 : index
    %c0_18 = arith.constant 0 : index
    %38 = vector.load %arg5[%c0_17, %c0_18] : memref<1x128xf32, #tpu.memory_space<vmem>>, vector<1x128xf32>
    %39 = vector.broadcast %38 : vector<1x128xf32> to vector<16x128xf32>
    %40 = arith.addf %37, %39 : vector<16x128xf32>
    %41 = arith.addf %1, %40 : vector<16x128xf32>
    %c0_19 = arith.constant 0 : index
    %c0_20 = arith.constant 0 : index
    %42 = vector.load %arg6[%c0_19, %c0_20] : memref<1x128xf32, #tpu.memory_space<vmem>>, vector<1x128xf32>
    %c0_21 = arith.constant 0 : index
    %c0_22 = arith.constant 0 : index
    %43 = vector.load %arg7[%c0_21, %c0_22] : memref<1x128xf32, #tpu.memory_space<vmem>>, vector<1x128xf32>
    %cst_23 = arith.constant dense<0.000000e+00> : vector<16xf32>
    %44 = vector.multi_reduction <add>, %41, %cst_23 [1] : vector<16x128xf32> to vector<16xf32>
    %45 = vector.shape_cast %44 : vector<16xf32> to vector<16x1xf32>
    %cst_24 = arith.constant 1.280000e+02 : f32
    %46 = vector.broadcast %cst_24 : f32 to vector<16x1xf32>
    %47 = arith.divf %45, %46 : vector<16x1xf32>
    %48 = vector.broadcast %47 : vector<16x1xf32> to vector<16x128xf32>
    %49 = arith.subf %41, %48 : vector<16x128xf32>
    %50 = arith.mulf %49, %49 : vector<16x128xf32>
    %cst_25 = arith.constant dense<0.000000e+00> : vector<16xf32>
    %51 = vector.multi_reduction <add>, %50, %cst_25 [1] : vector<16x128xf32> to vector<16xf32>
    %52 = vector.shape_cast %51 : vector<16xf32> to vector<16x1xf32>
    %cst_26 = arith.constant 1.280000e+02 : f32
    %53 = vector.broadcast %cst_26 : f32 to vector<16x1xf32>
    %54 = arith.divf %52, %53 : vector<16x1xf32>
    %55 = vector.broadcast %47 : vector<16x1xf32> to vector<16x128xf32>
    %56 = arith.subf %41, %55 : vector<16x128xf32>
    %cst_27 = arith.constant 9.99999974E-6 : f32
    %57 = vector.broadcast %cst_27 : f32 to vector<16x1xf32>
    %58 = arith.addf %54, %57 : vector<16x1xf32>
    %59 = math.rsqrt %58 : vector<16x1xf32>
    %60 = vector.broadcast %59 : vector<16x1xf32> to vector<16x128xf32>
    %61 = arith.mulf %56, %60 : vector<16x128xf32>
    %62 = vector.broadcast %42 : vector<1x128xf32> to vector<16x128xf32>
    %63 = arith.mulf %61, %62 : vector<16x128xf32>
    %64 = vector.broadcast %43 : vector<1x128xf32> to vector<16x128xf32>
    %65 = arith.addf %63, %64 : vector<16x128xf32>
    %c0_28 = arith.constant 0 : index
    %c0_29 = arith.constant 0 : index
    %66 = vector.load %arg8[%c0_28, %c0_29] : memref<128x256xf32, #tpu.memory_space<vmem>>, vector<128x256xf32>
    %cst_30 = arith.constant dense<0.000000e+00> : vector<16x256xf32>
    %67 = tpu.matmul %65, %66, %cst_30 {dimension_numbers = #tpu.dot_dimension_numbers<[1], [0], [0], [1], [0, 0, 1, 1], [], []>} : vector<16x128xf32>, vector<128x256xf32>, vector<16x256xf32> -> vector<16x256xf32>
    %c0_31 = arith.constant 0 : index
    %c0_32 = arith.constant 0 : index
    %68 = vector.load %arg9[%c0_31, %c0_32] : memref<1x256xf32, #tpu.memory_space<vmem>>, vector<1x256xf32>
    %69 = vector.broadcast %68 : vector<1x256xf32> to vector<16x256xf32>
    %70 = arith.addf %67, %69 : vector<16x256xf32>
    %cst_33 = arith.constant 5.000000e-01 : f32
    %71 = vector.broadcast %cst_33 : f32 to vector<16x256xf32>
    %72 = arith.mulf %71, %70 : vector<16x256xf32>
    %cst_34 = arith.constant 4.471500e-02 : f32
    %73 = vector.broadcast %cst_34 : f32 to vector<16x256xf32>
    %74 = arith.mulf %73, %70 : vector<16x256xf32>
    %75 = arith.mulf %74, %70 : vector<16x256xf32>
    %76 = arith.mulf %75, %70 : vector<16x256xf32>
    %77 = arith.addf %70, %76 : vector<16x256xf32>
    %cst_35 = arith.constant 0.797884583 : f32
    %78 = vector.broadcast %cst_35 : f32 to vector<16x256xf32>
    %79 = arith.mulf %78, %77 : vector<16x256xf32>
    %80 = math.tanh %79 : vector<16x256xf32>
    %cst_36 = arith.constant 1.000000e+00 : f32
    %81 = vector.broadcast %cst_36 : f32 to vector<16x256xf32>
    %82 = arith.addf %81, %80 : vector<16x256xf32>
    %83 = arith.mulf %72, %82 : vector<16x256xf32>
    %c0_37 = arith.constant 0 : index
    %c0_38 = arith.constant 0 : index
    %84 = vector.load %arg10[%c0_37, %c0_38] : memref<256x128xf32, #tpu.memory_space<vmem>>, vector<256x128xf32>
    %cst_39 = arith.constant dense<0.000000e+00> : vector<16x128xf32>
    %85 = tpu.matmul %83, %84, %cst_39 {dimension_numbers = #tpu.dot_dimension_numbers<[1], [0], [0], [1], [0, 0, 1, 1], [], []>} : vector<16x256xf32>, vector<256x128xf32>, vector<16x128xf32> -> vector<16x128xf32>
    %c0_40 = arith.constant 0 : index
    %c0_41 = arith.constant 0 : index
    %86 = vector.load %arg11[%c0_40, %c0_41] : memref<1x128xf32, #tpu.memory_space<vmem>>, vector<1x128xf32>
    %87 = vector.broadcast %86 : vector<1x128xf32> to vector<16x128xf32>
    %88 = arith.addf %85, %87 : vector<16x128xf32>
    %89 = arith.addf %65, %88 : vector<16x128xf32>
    %c0_42 = arith.constant 0 : index
    %c0_43 = arith.constant 0 : index
    %90 = vector.load %arg12[%c0_42, %c0_43] : memref<1x128xf32, #tpu.memory_space<vmem>>, vector<1x128xf32>
    %c0_44 = arith.constant 0 : index
    %c0_45 = arith.constant 0 : index
    %91 = vector.load %arg13[%c0_44, %c0_45] : memref<1x128xf32, #tpu.memory_space<vmem>>, vector<1x128xf32>
    %cst_46 = arith.constant dense<0.000000e+00> : vector<16xf32>
    %92 = vector.multi_reduction <add>, %89, %cst_46 [1] : vector<16x128xf32> to vector<16xf32>
    %93 = vector.shape_cast %92 : vector<16xf32> to vector<16x1xf32>
    %cst_47 = arith.constant 1.280000e+02 : f32
    %94 = vector.broadcast %cst_47 : f32 to vector<16x1xf32>
    %95 = arith.divf %93, %94 : vector<16x1xf32>
    %96 = vector.broadcast %95 : vector<16x1xf32> to vector<16x128xf32>
    %97 = arith.subf %89, %96 : vector<16x128xf32>
    %98 = arith.mulf %97, %97 : vector<16x128xf32>
    %cst_48 = arith.constant dense<0.000000e+00> : vector<16xf32>
    %99 = vector.multi_reduction <add>, %98, %cst_48 [1] : vector<16x128xf32> to vector<16xf32>
    %100 = vector.shape_cast %99 : vector<16xf32> to vector<16x1xf32>
    %cst_49 = arith.constant 1.280000e+02 : f32
    %101 = vector.broadcast %cst_49 : f32 to vector<16x1xf32>
    %102 = arith.divf %100, %101 : vector<16x1xf32>
    %103 = vector.broadcast %95 : vector<16x1xf32> to vector<16x128xf32>
    %104 = arith.subf %89, %103 : vector<16x128xf32>
    %cst_50 = arith.constant 9.99999974E-6 : f32
    %105 = vector.broadcast %cst_50 : f32 to vector<16x1xf32>
    %106 = arith.addf %102, %105 : vector<16x1xf32>
    %107 = math.rsqrt %106 : vector<16x1xf32>
    %108 = vector.broadcast %107 : vector<16x1xf32> to vector<16x128xf32>
    %109 = arith.mulf %104, %108 : vector<16x128xf32>
    %110 = vector.broadcast %90 : vector<1x128xf32> to vector<16x128xf32>
    %111 = arith.mulf %109, %110 : vector<16x128xf32>
    %112 = vector.broadcast %91 : vector<1x128xf32> to vector<16x128xf32>
    %113 = arith.addf %111, %112 : vector<16x128xf32>
    %c0_51 = arith.constant 0 : index
    %c0_52 = arith.constant 0 : index
    %c0_53 = arith.constant 0 : index
    %114 = vector.load %arg14[%c0_51, %c0_52, %c0_53] : memref<1x16x128xf32, #tpu.memory_space<vmem>>, vector<1x16x128xf32>
    %115 = vector.shape_cast %114 : vector<1x16x128xf32> to vector<16x128xf32>
    %116 = vector.shape_cast %113 : vector<16x128xf32> to vector<1x16x128xf32>
    tpu.vector_store %arg14[%c0_51, %c0_52, %c0_53], %116 {strides = array<i32>} : memref<1x16x128xf32, #tpu.memory_space<vmem>>, vector<1x16x128xf32>,
    return
  }
  func.func @transform_0(%arg0: i32) -> (i32, i32, i32) {
    %c0_i32 = arith.constant 0 : i32
    %c0_i32_0 = arith.constant 0 : i32
    %c0_i32_1 = arith.constant 0 : i32
    return %arg0, %c0_i32, %c0_i32_0 : i32, i32, i32
  }
  func.func @transform_1(%arg0: i32) -> (i32, i32, i32) {
    %c0_i32 = arith.constant 0 : i32
    %c0_i32_0 = arith.constant 0 : i32
    %c0_i32_1 = arith.constant 0 : i32
    return %arg0, %c0_i32, %c0_i32_0 : i32, i32, i32
  }
  func.func @transform_2(%arg0: i32) -> (i32, i32) {
    %c0_i32 = arith.constant 0 : i32
    %c0_i32_0 = arith.constant 0 : i32
    %c0_i32_1 = arith.constant 0 : i32
    return %c0_i32, %c0_i32_0 : i32, i32
  }
  func.func @transform_3(%arg0: i32) -> (i32, i32) {
    %c0_i32 = arith.constant 0 : i32
    %c0_i32_0 = arith.constant 0 : i32
    %c0_i32_1 = arith.constant 0 : i32
    return %c0_i32, %c0_i32_0 : i32, i32
  }
  func.func @transform_4(%arg0: i32) -> (i32, i32) {
    %c0_i32 = arith.constant 0 : i32
    %c0_i32_0 = arith.constant 0 : i32
    %c0_i32_1 = arith.constant 0 : i32
    return %c0_i32, %c0_i32_0 : i32, i32
  }
  func.func @transform_5(%arg0: i32) -> (i32, i32) {
    %c0_i32 = arith.constant 0 : i32
    %c0_i32_0 = arith.constant 0 : i32
    %c0_i32_1 = arith.constant 0 : i32
    return %c0_i32, %c0_i32_0 : i32, i32
  }
  func.func @transform_6(%arg0: i32) -> (i32, i32) {
    %c0_i32 = arith.constant 0 : i32
    %c0_i32_0 = arith.constant 0 : i32
    %c0_i32_1 = arith.constant 0 : i32
    return %c0_i32, %c0_i32_0 : i32, i32
  }
  func.func @transform_7(%arg0: i32) -> (i32, i32) {
    %c0_i32 = arith.constant 0 : i32
    %c0_i32_0 = arith.constant 0 : i32
    %c0_i32_1 = arith.constant 0 : i32
    return %c0_i32, %c0_i32_0 : i32, i32
  }
  func.func @transform_8(%arg0: i32) -> (i32, i32) {
    %c0_i32 = arith.constant 0 : i32
    %c0_i32_0 = arith.constant 0 : i32
    %c0_i32_1 = arith.constant 0 : i32
    return %c0_i32, %c0_i32_0 : i32, i32
  }
  func.func @transform_9(%arg0: i32) -> (i32, i32) {
    %c0_i32 = arith.constant 0 : i32
    %c0_i32_0 = arith.constant 0 : i32
    %c0_i32_1 = arith.constant 0 : i32
    return %c0_i32, %c0_i32_0 : i32, i32
  }
  func.func @transform_10(%arg0: i32) -> (i32, i32) {
    %c0_i32 = arith.constant 0 : i32
    %c0_i32_0 = arith.constant 0 : i32
    %c0_i32_1 = arith.constant 0 : i32
    return %c0_i32, %c0_i32_0 : i32, i32
  }
  func.func @transform_11(%arg0: i32) -> (i32, i32) {
    %c0_i32 = arith.constant 0 : i32
    %c0_i32_0 = arith.constant 0 : i32
    %c0_i32_1 = arith.constant 0 : i32
    return %c0_i32, %c0_i32_0 : i32, i32
  }
  func.func @transform_12(%arg0: i32) -> (i32, i32) {
    %c0_i32 = arith.constant 0 : i32
    %c0_i32_0 = arith.constant 0 : i32
    %c0_i32_1 = arith.constant 0 : i32
    return %c0_i32, %c0_i32_0 : i32, i32
  }
  func.func @transform_13(%arg0: i32) -> (i32, i32, i32) {
    %c0_i32 = arith.constant 0 : i32
    %c0_i32_0 = arith.constant 0 : i32
    %c0_i32_1 = arith.constant 0 : i32
    return %arg0, %c0_i32, %c0_i32_0 : i32, i32, i32
  }
}

</mosaic_0001>

<bundles_post_ra>
// kernel: tpu_custom_call.1
= control target key start
LH: loop header
LB: loop body
LE: loop exit
PB: predicated region body
PF: predicated region fallthrough
CT: control target
= control target key end

     0   :  { %s4763_s0 = inlined_call_operand.hbm [shape: f32[2,16,128], index: 0, kind: input, shape index: {}]   ;;  %s4764_s1 = inlined_call_operand.hbm [shape: f32[2,1,16], index: 1, kind: input, shape index: {}]   ;;  %s4765_s2 = inlined_call_operand.hbm [shape: f32[128,384], index: 2, kind: input, shape index: {}]   ;;  %s4766_s3 = inlined_call_operand.hbm [shape: f32[128,128], index: 3, kind: input, shape index: {}]   ;;  %s4767_s4 = inlined_call_operand.vmem [shape: f32[1,128], index: 4, kind: input, shape index: {}]   ;;  %s4768_s5 = inlined_call_operand.vmem [shape: f32[1,128], index: 5, kind: input, shape index: {}]   ;;  %s4769_s6 = inlined_call_operand.vmem [shape: f32[1,128], index: 6, kind: input, shape index: {}]   ;;  %s4770_s7 = inlined_call_operand.hbm [shape: f32[128,256], index: 7, kind: input, shape index: {}]   ;;  %s4771_s8 = inlined_call_operand.vmem [shape: f32[1,256], index: 8, kind: input, shape index: {}]   ;;  %s4772_s9 = inlined_call_operand.hbm [shape: f32[256,128], index: 9, kind: input, shape index: {}]   ;;  %s4773_s10 = inlined_call_operand.vmem [shape: f32[1,128], index: 10, kind: input, shape index: {}]   ;;  %s4774_s11 = inlined_call_operand.vmem [shape: f32[1,128], index: 11, kind: input, shape index: {}]   ;;  %s4775_s12 = inlined_call_operand.vmem [shape: f32[1,128], index: 12, kind: input, shape index: {}]   ;;  %s4776_s13 = inlined_call_operand.hbm [shape: f32[2,16,128], index: 13, kind: output, shape index: {}]  }
   0x1   :  { %4792 = sst [smem:[#allocation26_spill]] %s4763_s0 }
   0x2   :  { %4793 = sst [smem:[#allocation27_spill]] %s4765_s2 }
   0x3   :  { %4794 = sst [smem:[#allocation28_spill]] %s4766_s3 }
   0x4   :  { %4795 = sst [smem:[#allocation29_spill]] %s4770_s7 }
   0x5   :  { %4796 = sst [smem:[#allocation30_spill]] %s4772_s9 }
   0x6   :  { %4797 = sst [smem:[#allocation31_spill]] %s4776_s13 }
   0x7   :  { %18 = vsyncpa [#allocation3], 0 }
   0x8   :  { %20 = vsyncpa [#allocation3 + $0x1], 0 }
   0x9   :  { %21 = vsyncpa [#allocation6], 0 }
   0xa   :  { %23 = vsyncpa [#allocation6 + $0x1], 0 }
   0xb   :  { %24 = vsyncpa [#allocation9], 0 }
   0xc   :  { %25 = vsyncpa [#allocation12], 0 }
   0xd   :  { %26 = vsyncpa [#allocation4], 0 }
   0xe   :  { %28 = vsyncpa [#allocation4 + $0x1], 0  ;;  %s4129_s25 = smov 0   ;;  %s4131_s26 = smov 0  }
   0xf   :  { %s4133_s27 = smov 0   ;;  %s4135_s28 = smov 0  }
  0x10 LB: > { %4798 = sst [smem:[#allocation20_spill]] %s4023_s25  ;;  %s4150_s29 = sadd.s32 4294967295, %s4035_s28   ;;  %s4035_s28 = sphi %s4135_s28, %s4835_s28   ;;  %s4031_s27 = sphi %s4133_s27, %s4837_s27   ;;  %s4027_s26 = sphi %s4131_s26, %s4839_s26   ;;  %s4023_s25 = sphi %s4129_s25, %s4838_s25  }
  0x11   : > { %4799 = sst [smem:[#allocation21_spill]] %s4031_s27  ;;  %s3320_s30 = sadd.s32 4294967294, %s4035_s28  }
  0x12   : > { %p54_p0 = scmp.ne.s32.totalorder %s4027_s26, %s4023_s25  ;;  %p4777_p1 = scmp.eq.s32.totalorder %s4150_s29, 0 }
  0x13   : > { %p341_p3 = scmp.eq.s32.totalorder %s3320_s30, 1  ;;  %p3321_p5 = scmp.ge.s32.totalorder %s4035_s28, 1 }
  0x14   : > { %p4159_p4 = por %p4777_p1, %p54_p0  ;;  %p348_p7 = scmp.lt.s32.totalorder %s4035_s28, 3 }
  0x15   : > { %p4164_p6 = por %p341_p3, %p54_p0  ;;  %s4037_s17 = smov [#allocation7]  }
  0x16   : > { %s4800_s14 = scalar_select %p4159_p4, 1, 0 }
  0x17   : > { %s4801_s15 = scalar_select %p4164_p6, 1, 0 }
  0x18   : > { %p4169_p8 = pnand %p3321_p5, %p348_p7  ;;  %s360_s18 = sshll.u32 %s4037_s17, 4  ;;  %s361_s18 = int_to_ptr.vmem [resolvable:$true] %s360_s18 }
  0x19   : > { %4802 = sst [smem:[#allocation22_spill]] %s4801_s15  ;;  %s4038_s20 = smov [#allocation8]  }
  0x1a   : > { %s4803_s16 = scalar_select %p4169_p8, 1, 0 }
  0x1b   : > { %p3645_p9 = pneg %p4169_p8  ;;  %s373_s21 = sshll.u32 %s4038_s20, 4  ;;  %s374_s21 = int_to_ptr.vmem [resolvable:$true] %s373_s21 }
  0x1c   : > { %s3806_s22 = scalar_lea.vmem %s361_s18, 6144  ;;  %p3814_p5 = scmp.lt.s32.totalorder %s361_s18, %s361_s18 }
  0x1d   : > { %p4178_p11 = pnand %p3645_p9, %p4777_p1  ;;  %p3807_p13 = scmp.ne.s32.totalorder %s361_s18, %s3806_s22 }
  0x1e   : > { %p3815_p7 = scmp.lt.s32.totalorder %s3806_s22, %s3806_s22 }
  0x1f   : > { %p3797_p12 = pneg %p4178_p11 }
  0x20   : > { %p3816_p10 = por %p3815_p7, %p3814_p5 }
  0x21   : > { %p3809_p0 = pnand %p3807_p13, %p3797_p12 }
  0x23   : > { %p3810_p3 = pneg %p3809_p0 }
  0x25   : > { %p3817_p9 = pnand %p3816_p10, %p3810_p3 }
  0x27   : > { %3820 = shalt.err (!%p3817_p9)
}
  0x28   : > { %s4039_s23 = smov 384   ;;  %s4040_s24 = smov 24  }
  0x29   : > { %s4805_s2 = sld [smem:[#allocation27_spill]]  ;;  %s3832_s20 = scalar_lea.vmem %s374_s21, 2048 }
  0x2a   : > { %p3833_p1 = scmp.ne.s32.totalorder %s374_s21, %s3832_s20  ;;  %p3840_p2 = scmp.lt.s32.totalorder %s374_s21, %s374_s21 }
  0x2b   : > { %p3841_p6 = scmp.lt.s32.totalorder %s3832_s20, %s3832_s20 }
  0x2c   : > { %p3835_p13 = pnand %p3833_p1, %p3797_p12 }
  0x2d   : > { %p3842_p5 = por %p3841_p6, %p3840_p2 }
  0x2e   : > { %p3836_p0 = pneg %p3835_p13 }
  0x2f   : > { %3648 = dma.hbm_to_vmem [thread:$0]  (!%p4178_p11), %s4805_s2, 6144, %s361_s18, [#allocation6], %s4039_s23, %s4039_s23, %s4040_s24  }
  0x30   : > { %p3843_p10 = pnand %p3842_p5, %p3836_p0 }
  0x32   : > { %3846 = shalt.err (!%p3843_p10)
}
  0x33   : > { %s4779_s22 = smov 128   ;;  %s4781_s15 = smov 8  }
  0x34   : > { %s4806_s3 = sld [smem:[#allocation28_spill]]  ;;  %s4043_s24 = smov [#allocation10]  }
  0x35   : > { %s395_s30 = sshll.u32 %s4043_s24, 4  ;;  %s396_s30 = int_to_ptr.vmem [resolvable:$true] %s395_s30 }
  0x36   : > { %s3858_s17 = scalar_lea.vmem %s396_s30, 4096  ;;  %p3866_p3 = scmp.lt.s32.totalorder %s396_s30, %s396_s30 }
  0x37   : > { %p3859_p1 = scmp.ne.s32.totalorder %s396_s30, %s3858_s17  ;;  %p3867_p7 = scmp.lt.s32.totalorder %s3858_s17, %s3858_s17 }
  0x39   : > { %p3861_p2 = pnand %p3859_p1, %p3797_p12  ;;  %p3868_p9 = por %p3867_p7, %p3866_p3 }
  0x3a   : > { %3651 = dma.hbm_to_vmem [thread:$0]  (!%p4178_p11), %s4806_s3, 2048, %s374_s21, [#allocation9], %s4779_s22, %s4779_s22, %s4781_s15  }
  0x3b   : > { %p3862_p6 = pneg %p3861_p2 }
  0x3d   : > { %p3869_p13 = pnand %p3868_p9, %p3862_p6 }
  0x3f   : > { %3872 = shalt.err (!%p3869_p13)
}
  0x40   : > { %s4044_s20 = smov 256   ;;  %s4045_s2 = smov 16  }
  0x41   : > { %s4807_s7 = sld [smem:[#allocation29_spill]]  ;;  %s4046_s23 = smov [#allocation11]  }
  0x42   : > { %s411_s24 = sshll.u32 %s4046_s23, 4  ;;  %s412_s24 = int_to_ptr.vmem [resolvable:$true] %s411_s24 }
  0x43   : > { %s3884_s22 = scalar_lea.vmem %s412_s24, 4096  ;;  %p3892_p1 = scmp.lt.s32.totalorder %s412_s24, %s412_s24 }
  0x44   : > { %p3885_p0 = scmp.ne.s32.totalorder %s412_s24, %s3884_s22  ;;  %p3893_p2 = scmp.lt.s32.totalorder %s3884_s22, %s3884_s22 }
  0x46   : > { %p3887_p5 = pnand %p3885_p0, %p3797_p12  ;;  %p3894_p6 = por %p3893_p2, %p3892_p1 }
  0x47   : > { %3654 = dma.hbm_to_vmem [thread:$0]  (!%p4178_p11), %s4807_s7, 4096, %s396_s30, [#allocation9], %s4044_s20, %s4044_s20, %s4045_s2  }
  0x48   : > { %p3888_p10 = pneg %p3887_p5 }
  0x4a   : > { %p3895_p3 = pnand %p3894_p6, %p3888_p10 }
  0x4c   : > { %3898 = shalt.err (!%p3895_p3)
}
  0x4d   : > { %s4808_s17 = smov 128   ;;  %s4809_s9 = sld [smem:[#allocation30_spill]] }
  0x4e   : > { %s4223_s22 = sadd.s32 1, %s4035_s28   ;;  %s41_s19 = sadd.s32 1, %s4031_s27 }
  0x4f   : > { %4810 = sst [smem:[#allocation23_spill]] %s4223_s22  ;;  %s38_s20 = ssub.s32 %s4035_s28, %s4223_s22 }
  0x50   : > { %p48_p12 = scmp.ne.s32.totalorder %s4031_s27, %s4027_s26  ;;  %p39_p7 = scmp.eq.s32.totalorder %s38_s20, 0 }
  0x51   : > { %p49_p9 = scmp.eq.s32.totalorder %s4035_s28, 0  ;;  %p4811_p13 = scmp.eq.s32.totalorder %s4150_s29, 1 }
  0x52   : > { %p3673_p5 = scmp.lt.s32.totalorder %s4035_s28, 2  ;;  %s4242_s23 = sand.u32 1, %s4031_s27  }
  0x53   : > { %3657 = dma.hbm_to_vmem [thread:$0]  (!%p4178_p11), %s4809_s9, 4096, %s412_s24, [#allocation12], %s4808_s17, %s4808_s17, %s4781_s15  }
  0x54   : > { %p4233_p0 = por %p4811_p13, %p48_p12  ;;  %p50_p10 = por %p49_p9, %p48_p12 }
  0x55   : > { %s4239_s18 = scalar_select %p39_p7, %s4031_s27, %s41_s19  }
  0x56   : > { %s4812_s21 = scalar_select %p4233_p0, 1, 0 }
  0x57   : > { %4814 = sst [smem:[#allocation25_spill]] %s4239_s18  ;;  %s3327_s24 = sshll.u32 %s4242_s23, 4 }
  0x58   : > { %4813 = sst [smem:[#allocation24_spill]] %s4812_s21  ;;  %s3389_s2 = sshll.u32 %s4035_s28, 8 }
  0x59   : > { %s4815_s0 = sld [smem:[#allocation26_spill]]  ;;  %s438_s3 = scalar_lea.vmem [#allocation2], %s3327_s24 }
  0x5a   : > { %s445_s7 = sshll.u32 %s438_s3, 4  ;;  %p4253_p11 = pnand %p3673_p5, %p50_p10  ;;  %s4251_s7 = int_to_ptr.vmem [resolvable:$true] %s445_s7 }
  0x5c   : > { %p3901_p2 = pneg %p4253_p11 }
  0x5f   : > { %s4249_s20 = scalar_lea.hbm %s4815_s0, %s3389_s2  ;;  %s3904_s24 = scalar_lea.hbm %s4815_s0, 512 }
  0x60   : > { %s3899_s27 = scalar_lea.hbm %s4249_s20, 256  ;;  %p3905_p12 = scmp.lt.s32.totalorder %s4249_s20, %s4815_s0 }
  0x61   : > { %p3900_p1 = scmp.ne.s32.totalorder %s4249_s20, %s3899_s27  ;;  %p3906_p7 = scmp.lt.s32.totalorder %s3904_s24, %s3899_s27 }
  0x63   : > { %p3902_p6 = pnand %p3901_p2, %p3900_p1  ;;  %p3907_p9 = por %p3906_p7, %p3905_p12 }
  0x65   : > { %p3903_p3 = pneg %p3902_p6 }
  0x67   : > { %p3908_p13 = pnand %p3907_p9, %p3903_p3 }
  0x69   : > { %3911 = shalt.err (!%p3908_p13)
}
  0x6a   : > { %s3912_s9 = scalar_lea.vmem %s4251_s7, 256  ;;  %s4047_s15 = smov [#allocation2]  }
  0x6b   : > { %p3913_p5 = scmp.ne.s32.totalorder %s4251_s7, %s3912_s9  ;;  %s3917_s3 = sshll.u32 %s4047_s15, 4  ;;  %s3918_s3 = int_to_ptr.vmem [resolvable:$false] %s3917_s3 }
  0x6c   : > { %s3919_s18 = scalar_lea.vmem %s3918_s3, 512  ;;  %p3920_p6 = scmp.lt.s32.totalorder %s4251_s7, %s3918_s3 }
  0x6d   : > { %p3915_p10 = pnand %p3913_p5, %p3901_p2  ;;  %p3921_p0 = scmp.lt.s32.totalorder %s3919_s18, %s3912_s9 }
  0x6f   : > { %p3916_p1 = pneg %p3915_p10  ;;  %p3922_p4 = por %p3921_p0, %p3920_p6 }
  0x71   : > { %p3923_p12 = pnand %p3922_p4, %p3916_p1 }
  0x73   : > { %3926 = shalt.err (!%p3923_p12)
}
  0x74   : > { %s4817_s27 = smov 8   ;;  %s4818_s24 = scalar_lea.sflag [#allocation3], %s4242_s23 }
  0x75   : > { %3661 = dma.hbm_to_vmem [thread:$0]  (!%p4253_p11), %s4249_s20, 256, %s4251_s7, %s4818_s24, %s4808_s17, %s4808_s17, %s4817_s27  }
  0x76   : > { %s3330_s2 = sshll.u32 %s4035_s28, 4  ;;  %s458_s30 = scalar_lea.vmem [#allocation5], %s4242_s23 }
  0x77   : > { %s465_s9 = sshll.u32 %s458_s30, 4  ;;  %s463_s3 = scalar_lea.hbm %s4764_s1, %s3330_s2  ;;  %s466_s9 = int_to_ptr.vmem [resolvable:$true] %s465_s9 }
  0x78   : > { %s4819_s0 = sand.u32 1, %s4035_s28   ;;  %s3927_s25 = scalar_lea.hbm %s463_s3, 16 }
  0x79   : > { %s456_s22 = scalar_lea.sflag [#allocation6], %s4819_s0  ;;  %p3928_p4 = scmp.ne.s32.totalorder %s463_s3, %s3927_s25 }
  0x7a   : > { %s3932_s7 = scalar_lea.hbm %s4764_s1, 32  ;;  %p3933_p7 = scmp.lt.s32.totalorder %s463_s3, %s4764_s1 }
  0x7b   : > { %p3930_p0 = pnand %p3928_p4, %p3901_p2  ;;  %p3934_p9 = scmp.lt.s32.totalorder %s3932_s7, %s3927_s25 }
  0x7d   : > { %p3931_p3 = pneg %p3930_p0  ;;  %p3935_p13 = por %p3934_p9, %p3933_p7 }
  0x7f   : > { %p3936_p5 = pnand %p3935_p13, %p3931_p3 }
  0x81   : > { %3939 = shalt.err (!%p3936_p5)
}
  0x82   : > { %s3940_s20 = scalar_lea.vmem %s466_s9, 16  ;;  %s4048_s0 = smov [#allocation5]  }
  0x83   : > { %p3941_p10 = scmp.ne.s32.totalorder %s466_s9, %s3940_s20  ;;  %s3945_s27 = sshll.u32 %s4048_s0, 4  ;;  %s3946_s27 = int_to_ptr.vmem [resolvable:$false] %s3945_s27 }
  0x84   : > { %s3947_s13 = scalar_lea.vmem %s3946_s27, 32  ;;  %p3948_p12 = scmp.lt.s32.totalorder %s466_s9, %s3946_s27 }
  0x85   : > { %p3943_p1 = pnand %p3941_p10, %p3901_p2  ;;  %p3949_p4 = scmp.lt.s32.totalorder %s3947_s13, %s3940_s20 }
  0x87   : > { %p3944_p6 = pneg %p3943_p1  ;;  %p3950_p0 = por %p3949_p4, %p3948_p12 }
  0x89   : > { %p3951_p8 = pnand %p3950_p0, %p3944_p6 }
  0x8b   : > { %3954 = shalt.err (!%p3951_p8)
}
  0x8c   : > { %3664 = dma.hbm_to_vmem [thread:$0]  (!%p4253_p11), %s463_s3, 16, %s466_s9, %s456_s22  }
  0x8d   : > { %p4820_p3 = scmp.ne.s32.totalorder %s4803_s16, 0 }
  0x8e   : > { %s4312_s25 = sand.u32 (!%p4820_p3), 1, %s4027_s26   ;;  %p4821_p2 = scmp.ne.s32.totalorder (!%p4820_p3), %s4800_s14, 0 }
  0x8f   : > { %474 = sbr.rel (%p4820_p3) target bundleno = 2691 (0xa83), region = 72  ;;  %s3332_s21 = sshll.u32 (!%p4820_p3), %s4312_s25, 4 }
  0x90   : > { %s477_s24 = scalar_lea.sflag (!%p4820_p3), [#allocation3], %s4312_s25  ;;  %s4318_s2 = scalar_lea.vmem (!%p4820_p3), [#allocation2], %s3332_s21 }
  0x94   : > { %3998 = dma.done.wait (%p4821_p2), %s477_s24, 256  }
  0x95   : > { %4000 = vsyncadd (%p4821_p2), %s477_s24, 4294967040  ;;  %s485_s16 = sand.u32 1, %s4150_s29   ;;  %s488_s19 = scalar_lea.vmem [#allocation5], %s4312_s25 }
  0x96   : > { %s486_s22 = scalar_lea.sflag [#allocation6], %s485_s16 }
  0x97   : > { %4002 = dma.done.wait (%p4821_p2), %s486_s22, 16  }
  0x98   : > { %4004 = vsyncadd (%p4821_p2), %s486_s22, 4294967280  ;;  %p4822_p8 = scmp.eq.s32.totalorder %s4150_s29, 0 }
  0x9a   : > { %4006 = dma.done.wait (%p4822_p8), [#allocation6], 6144   ;;  %p4823_p11 = pmov %p4822_p8 }
  0x9b   : > { %p4824_p7 = pmov %p4822_p8 }
  0x9c   : > { %4008 = vsyncadd (%p4823_p11), [#allocation6], 4294961152 }
  0x9d   : > { %4010 = dma.done.wait (%p4824_p7), [#allocation9], 6144   ;;  %p4825_p9 = pmov %p4824_p7 }
  0x9e   : > { %p4826_p13 = pmov %p4824_p7 }
  0x9f   : > { %4012 = vsyncadd (%p4825_p9), [#allocation9], 4294961152 }
  0xa0   : > { %4014 = dma.done.wait (%p4826_p13), [#allocation12], 4096   ;;  %p4827_p5 = pmov %p4824_p7 }
  0xa1   : > { %v4049_v0 = vmov 0.0   ;;  %v600_v1 = vld [vmem:[#allocation7 + $0x170] sm:$0xff]  ;;  %v599_v2 = vld [vmem:[#allocation7 + $0x168] sm:$0xff]  ;;  %v597_v3 = vld [vmem:[#allocation7 + $0x158] sm:$0xff]  ;;  %s4050_s14 = smov 64   ;;  %s4051_s30 = smov 96   ;;  %v779_v57 = vlaneseq }
  0xa2   : > { %4016 = vsyncadd (%p4827_p5), [#allocation12], 4294963200  ;;  %666 = vmatprep.mubr.f32.mxu0 %v4049_v0  ;;  %602 = vmatprep.subr.mxu0 %v600_v1  ;;  %v596_v4 = vld [vmem:[#allocation7 + $0x150] sm:$0xff]  ;;  %v594_v5 = vld [vmem:[#allocation7 + $0x140] sm:$0xff]  ;;  %s4052_s9 = smov 32   ;;  %vm1630_vm0 = vcmask 261120  }
  0xa3   : > { %603 = vmatpush1.msra.mxu0 %v599_v2  ;;  %v593_v6 = vld [vmem:[#allocation7 + $0x138] sm:$0xff]  ;;  %v591_v7 = vld [vmem:[#allocation7 + $0x128] sm:$0xff]  ;;  %v590_v8 = vld [vmem:[#allocation7 + $0x120] sm:$0xff]  ;;  %v4053_v55 = vmov 1983009808   ;;  %v4368_v61 = vshrl.u32 %v779_v57, 7 }
  0xa4   : > { %604 = vmatprep.subr.mxu0 %v597_v3  ;;  %v588_v9 = vld [vmem:[#allocation7 + $0x110] sm:$0xff]  ;;  %v587_v10 = vld [vmem:[#allocation7 + $0x108] sm:$0xff]  ;;  %v585_v11 = vld [vmem:[#allocation7 + $0xf8] sm:$0xff]  ;;  %v777_v56 = vunpack.c.l.s4 %v4053_v55  ;;  %v4054_v58 = vmov 1934713408   ;;  %vm2002_vm3 = vcmask 130048  }
  0xa5   : > { %605 = vmatpush1.msra.mxu0 %v596_v4  ;;  %v584_v12 = vld [vmem:[#allocation7 + $0xf0] sm:$0xff]  ;;  %v582_v13 = vld [vmem:[#allocation7 + $0xe0] sm:$0xff]  ;;  %v581_v15 = vld [vmem:[#allocation7 + $0xd8] sm:$0xff]  ;;  %v809_v59 = vunpack.c.l.s4 %v4054_v58  ;;  %vm2713_vm4 = vcmask 523264   ;;  %vm2716_vm5 = vcmask 785408   ;;  %s4829_s3 = sld [smem:[#allocation31_spill]] }
  0xa6   : > { %606 = vmatprep.subr.mxu0 %v594_v5  ;;  %v551_v14 = vld [vmem:[%s4318_s2] sm:$0xff]  ;;  %v552_v34 = vld [vmem:[%s4318_s2 + $0x8] sm:$0xff]  ;;  %v778_v60 = vunpack.c.0.s8 %v777_v56  ;;  %s3176_s17 = scalar_lea.sflag [#allocation4], %s4312_s25 }
  0xa7   : > { %607 = vmatpush1.msra.mxu0 %v593_v6  ;;  %3529 = vmatprep.mubr.f32.mxu1 %v551_v14  ;;  %v579_v16 = vld [vmem:[#allocation7 + $0xc8] sm:$0xff]  ;;  %v578_v17 = vld [vmem:[#allocation7 + $0xc0] sm:$0xff]  ;;  %v576_v18 = vld [vmem:[#allocation7 + $0xb0] sm:$0xff]  ;;  %v810_v1 = vunpack.c.0.s8 %v809_v59 }
  0xa8   : > { %608 = vmatprep.subr.mxu0 %v591_v7  ;;  %v575_v19 = vld [vmem:[#allocation7 + $0xa8] sm:$0xff]  ;;  %v573_v20 = vld [vmem:[#allocation7 + $0x98] sm:$0xff]  ;;  %v572_v21 = vld [vmem:[#allocation7 + $0x90] sm:$0xff]  ;;  %v4371_v2 = vsub.s32 %v778_v60, %v4368_v61 }
  0xa9   : > { %609 = vmatpush1.msra.mxu0 %v590_v8  ;;  %v570_v22 = vld [vmem:[#allocation7 + $0x80] sm:$0xff]  ;;  %v569_v23 = vld [vmem:[#allocation7 + $0x78] sm:$0xff]  ;;  %v567_v24 = vld [vmem:[#allocation7 + $0x68] sm:$0xff] }
  0xaa   : > { %610 = vmatprep.subr.mxu0 %v588_v9  ;;  %v566_v25 = vld [vmem:[#allocation7 + $0x60] sm:$0xff]  ;;  %v564_v26 = vld [vmem:[#allocation7 + $0x50] sm:$0xff]  ;;  %v563_v27 = vld [vmem:[#allocation7 + $0x48] sm:$0xff]  ;;  %v4374_v9 = vsub.s32 %v810_v1, %v4368_v61 }
  0xab   : > { %611 = vmatpush1.msra.mxu0 %v587_v10  ;;  %v561_v28 = vld [vmem:[#allocation7 + $0x38] sm:$0xff]  ;;  %v560_v29 = vld [vmem:[#allocation7 + $0x30] sm:$0xff]  ;;  %v558_v30 = vld [vmem:[#allocation7 + $0x20] sm:$0xff] }
  0xac   : > { %612 = vmatprep.subr.mxu0 %v585_v11  ;;  %v557_v31 = vld [vmem:[#allocation7 + $0x18] sm:$0xff]  ;;  %v555_v32 = vld [vmem:[#allocation7 + $0x8] sm:$0xff]  ;;  %v554_v33 = vld [vmem:[#allocation7] sm:$0xff] }
  0xad   : > { %613 = vmatpush1.msra.mxu0 %v584_v12  ;;  %v601_v35 = vld [vmem:[#allocation7 + $0x178] sm:$0xff]  ;;  %v598_v36 = vld [vmem:[#allocation7 + $0x160] sm:$0xff]  ;;  %v595_v37 = vld [vmem:[#allocation7 + $0x148] sm:$0xff] }
  0xae   : > { %614 = vmatprep.subr.mxu0 %v582_v13  ;;  %3497 = vmatprep.subr.mxu1 %v601_v35  ;;  %v592_v38 = vld [vmem:[#allocation7 + $0x130] sm:$0xff]  ;;  %v589_v39 = vld [vmem:[#allocation7 + $0x118] sm:$0xff]  ;;  %v586_v40 = vld [vmem:[#allocation7 + $0x100] sm:$0xff] }
  0xaf   : > { %615 = vmatpush1.msra.mxu0 %v581_v15  ;;  %3498 = vmatpush3.msra.mxu1 %v601_v35  ;;  %v583_v41 = vld [vmem:[#allocation7 + $0xe8] sm:$0xff]  ;;  %v580_v42 = vld [vmem:[#allocation7 + $0xd0] sm:$0xff]  ;;  %v577_v43 = vld [vmem:[#allocation7 + $0xb8] sm:$0xff] }
  0xb0   : > { %616 = vmatprep.subr.mxu0 %v579_v16  ;;  %3499 = vmatprep.subr.mxu1 %v598_v36  ;;  %v574_v44 = vld [vmem:[#allocation7 + $0xa0] sm:$0xff]  ;;  %v571_v45 = vld [vmem:[#allocation7 + $0x88] sm:$0xff]  ;;  %v568_v46 = vld [vmem:[#allocation7 + $0x70] sm:$0xff] }
  0xb1   : > { %617 = vmatpush1.msra.mxu0 %v578_v17  ;;  %3500 = vmatpush3.msra.mxu1 %v598_v36  ;;  %v565_v47 = vld [vmem:[#allocation7 + $0x58] sm:$0xff]  ;;  %v562_v48 = vld [vmem:[#allocation7 + $0x40] sm:$0xff]  ;;  %v559_v50 = vld [vmem:[#allocation7 + $0x28] sm:$0xff] }
  0xb2   : > { %618 = vmatprep.subr.mxu0 %v576_v18  ;;  %3501 = vmatprep.subr.mxu1 %v595_v37  ;;  %v556_v54 = vld [vmem:[#allocation7 + $0x10] sm:$0xff] }
  0xb3   : > { %619 = vmatpush1.msra.mxu0 %v575_v19  ;;  %3502 = vmatpush3.msra.mxu1 %v595_v37 }
  0xb4   : > { %620 = vmatprep.subr.mxu0 %v573_v20  ;;  %3503 = vmatprep.subr.mxu1 %v592_v38 }
  0xb5   : > { %621 = vmatpush1.msra.mxu0 %v572_v21  ;;  %3504 = vmatpush3.msra.mxu1 %v592_v38 }
  0xb6   : > { %622 = vmatprep.subr.mxu0 %v570_v22  ;;  %3505 = vmatprep.subr.mxu1 %v589_v39 }
  0xb7   : > { %623 = vmatpush1.msra.mxu0 %v569_v23  ;;  %3506 = vmatpush3.msra.mxu1 %v589_v39 }
  0xb8   : > { %624 = vmatprep.subr.mxu0 %v567_v24  ;;  %3507 = vmatprep.subr.mxu1 %v586_v40 }
  0xb9   : > { %625 = vmatpush1.msra.mxu0 %v566_v25  ;;  %3508 = vmatpush3.msra.mxu1 %v586_v40 }
  0xba   : > { %626 = vmatprep.subr.mxu0 %v564_v26  ;;  %3509 = vmatprep.subr.mxu1 %v583_v41 }
  0xbb   : > { %627 = vmatpush1.msra.mxu0 %v563_v27  ;;  %3510 = vmatpush3.msra.mxu1 %v583_v41 }
  0xbc   : > { %628 = vmatprep.subr.mxu0 %v561_v28  ;;  %3511 = vmatprep.subr.mxu1 %v580_v42 }
  0xbd   : > { %629 = vmatpush1.msra.mxu0 %v560_v29  ;;  %3512 = vmatpush3.msra.mxu1 %v580_v42 }
  0xbe   : > { %630 = vmatprep.subr.mxu0 %v558_v30  ;;  %3513 = vmatprep.subr.mxu1 %v577_v43 }
  0xbf   : > { %631 = vmatpush1.msra.mxu0 %v557_v31  ;;  %3514 = vmatpush3.msra.mxu1 %v577_v43 }
  0xc0   : > { %632 = vmatprep.subr.mxu0 %v555_v32  ;;  %3515 = vmatprep.subr.mxu1 %v574_v44 }
  0xc1   : > { %633 = vmatpush1.msra.mxu0 %v554_v33  ;;  %3516 = vmatpush3.msra.mxu1 %v574_v44 }
  0xc2   : > { %667 = vmatmul.mubr.f32.vlgmr.msra.gmra.mxu0 %v551_v14  ;;  %3517 = vmatprep.subr.mxu1 %v571_v45 }
  0xc3   : > { %672 = vmatprep.mubr.f32.mxu0 %v4049_v0  ;;  %3518 = vmatpush3.msra.mxu1 %v571_v45 }
  0xc4   : > { %3519 = vmatprep.subr.mxu1 %v568_v46 }
  0xc5   : > { %3520 = vmatpush3.msra.mxu1 %v568_v46 }
  0xc6   : > { %673 = vmatmul.mubr.f32.gmra.mxu0 %v552_v34  ;;  %3521 = vmatprep.subr.mxu1 %v565_v47 }
  0xc7   : > { %3522 = vmatpush3.msra.mxu1 %v565_v47 }
  0xc8   : > { %3523 = vmatprep.subr.mxu1 %v562_v48 }
  0xc9   : > { %3524 = vmatpush3.msra.mxu1 %v562_v48 }
  0xca   : > { %3525 = vmatprep.subr.mxu1 %v559_v50 }
  0xcb   : > { %3526 = vmatpush3.msra.mxu1 %v559_v50 }
  0xcc   : > { %3527 = vmatprep.subr.mxu1 %v556_v54 }
  0xcd   : > { %3528 = vmatpush3.msra.mxu1 %v556_v54 }
  0xce   : > { %3530 = vmatmul.mubr.f32.vlgmr.msra.gmra.mxu1 %v552_v34 }
 0x182   : > { %v4346_v49 = vpop.f32.mrf.mxu0 }
 0x184   : > { %v670_v51 = vpop.f32.mrf.mxu0 }
 0x185   : > { %1054 = vrot.lane.b32.xlu0 %v670_v51, %s4050_s14  ;;  %1048 = vrot.lane.b32.xlu1 %v670_v51, %s4051_s30 }
 0x186   : > { %v4350_v52 = vpop.f32.mrf.mxu0 }
 0x188   : > { %v676_v53 = vpop.f32.mrf.mxu0 }
 0x189   : > { %1060 = vrot.lane.b32.xlu1 %v670_v51, %s4052_s9  ;;  %1050 = vrot.lane.b32.xlu0 %v676_v53, %s4051_s30 }
 0x18d   : > { %1062 = vrot.lane.b32.xlu1 %v676_v53, %s4052_s9  ;;  %1056 = vrot.lane.b32.xlu0 %v676_v53, %s4050_s14 }
 0x191   : > { %762 = vrot.lane.b32.xlu1 %v4346_v49, %s4050_s14  ;;  %756 = vrot.lane.b32.xlu0 %v4346_v49, %s4051_s30 }
 0x195   : > { %758 = vrot.lane.b32.xlu1 %v4350_v52, %s4051_s30  ;;  %768 = vrot.lane.b32.xlu0 %v4346_v49, %s4052_s9 }
 0x199   : > { %770 = vrot.lane.b32.xlu1 %v4350_v52, %s4052_s9  ;;  %764 = vrot.lane.b32.xlu0 %v4350_v52, %s4050_s14 }
 0x1f7   : > { %v1055_v62 = vpop.permute.xlu0 %1054  ;;  %v1049_v63 = vpop.permute.xlu1 %1048 }
 0x1f8   : > { %v1066_v3 = vcombine.low %v670_v51, %v1055_v62  ;;  %v1067_v4 = vcombine.high %v670_v51, %v1055_v62 }
 0x1fa   : > { %v1074_v10 = vrot.slane %v1066_v3, %v4371_v2  ;;  %v1081_v11 = vrot.slane %v1067_v4, %v4371_v2 }
 0x1fb   : > { %v1061_v5 = vpop.permute.xlu1 %1060  ;;  %v1051_v6 = vpop.permute.xlu0 %1050 }
 0x1fc   : > { %v1082_v7 = vcombine.low %v1049_v63, %v1061_v5  ;;  %v1083_v8 = vcombine.high %v1049_v63, %v1061_v5 }
 0x1fe   : > { %v1090_v12 = vrot.slane %v1082_v7, %v4371_v2  ;;  %v1097_v13 = vrot.slane %v1083_v8, %v4371_v2 }
 0x1ff   : > { %v1063_v14 = vpop.permute.xlu1 %1062  ;;  %v1057_v15 = vpop.permute.xlu0 %1056 }
 0x200   : > { %v1098_v16 = vcombine.low %v1074_v10, %v1090_v12  ;;  %v1099_v17 = vcombine.high %v1074_v10, %v1090_v12  ;;  %v1114_v18 = vcombine.low %v1081_v11, %v1097_v13  ;;  %v1115_v19 = vcombine.high %v1081_v11, %v1097_v13 }
 0x201   : > { %v1150_v20 = vcombine.low %v1051_v6, %v1063_v14  ;;  %v1151_v21 = vcombine.high %v1051_v6, %v1063_v14  ;;  %v1134_v22 = vcombine.low %v676_v53, %v1057_v15  ;;  %v1135_v23 = vcombine.high %v676_v53, %v1057_v15 }
 0x202   : > { %v1106_v24 = vrot.slane %v1098_v16, %v4374_v9  ;;  %v1113_v25 = vrot.slane %v1099_v17, %v4374_v9  ;;  %v1122_v26 = vrot.slane %v1114_v18, %v4374_v9  ;;  %v1129_v27 = vrot.slane %v1115_v19, %v4374_v9 }
 0x203   : > { %v1158_v28 = vrot.slane %v1150_v20, %v4371_v2  ;;  %v1165_v29 = vrot.slane %v1151_v21, %v4371_v2  ;;  %v1142_v30 = vrot.slane %v1134_v22, %v4371_v2  ;;  %v1149_v31 = vrot.slane %v1135_v23, %v4371_v2  ;;  %v763_v32 = vpop.permute.xlu1 %762  ;;  %v757_v33 = vpop.permute.xlu0 %756 }
 0x204   : > { %v1202_v34 = vcombine.low %v1106_v24, %v1113_v25  ;;  %v3342_v35 = vcombine.high %v1106_v24, %v1113_v25  ;;  %v1218_v36 = vcombine.low %v1122_v26, %v1129_v27  ;;  %v3343_v37 = vcombine.high %v1122_v26, %v1129_v27 }
 0x205   : > { %v1166_v38 = vcombine.low %v1142_v30, %v1158_v28  ;;  %v1167_v39 = vcombine.high %v1142_v30, %v1158_v28  ;;  %v1182_v40 = vcombine.low %v1149_v31, %v1165_v29  ;;  %v1183_v41 = vcombine.high %v1149_v31, %v1165_v29 }
 0x206   : > { %v4389_v42 = vrot.slane %v1202_v34, %v4371_v2  ;;  %v4392_v43 = vrot.slane %v3342_v35, %v4371_v2  ;;  %v4395_v44 = vrot.slane %v1218_v36, %v4371_v2  ;;  %v4398_v45 = vrot.slane %v3343_v37, %v4371_v2 }
 0x207   : > { %v1174_v46 = vrot.slane %v1166_v38, %v4374_v9  ;;  %v1181_v47 = vrot.slane %v1167_v39, %v4374_v9  ;;  %v1190_v48 = vrot.slane %v1182_v40, %v4374_v9  ;;  %v1197_v50 = vrot.slane %v1183_v41, %v4374_v9  ;;  %v759_v51 = vpop.permute.xlu1 %758  ;;  %v769_v53 = vpop.permute.xlu0 %768 }
 0x208   : > { %v774_v54 = vcombine.low %v4346_v49, %v763_v32  ;;  %v775_v55 = vcombine.high %v4346_v49, %v763_v32  ;;  %v790_v56 = vcombine.low %v757_v33, %v769_v53  ;;  %v791_v57 = vcombine.high %v757_v33, %v769_v53 }
 0x209   : > { %v1270_v58 = vcombine.low %v1174_v46, %v1181_v47  ;;  %v3344_v59 = vcombine.high %v1174_v46, %v1181_v47  ;;  %v1286_v60 = vcombine.low %v1190_v48, %v1197_v50  ;;  %v3345_v62 = vcombine.high %v1190_v48, %v1197_v50 }
 0x20a   : > { %v782_v63 = vrot.slane %v774_v54, %v4371_v2  ;;  %v789_v1 = vrot.slane %v775_v55, %v4371_v2  ;;  %v798_v3 = vrot.slane %v790_v56, %v4371_v2  ;;  %v805_v4 = vrot.slane %v791_v57, %v4371_v2 }
 0x20b   : > { %v4411_v5 = vrot.slane %v1270_v58, %v4371_v2  ;;  %v4414_v6 = vrot.slane %v3344_v59, %v4371_v2  ;;  %v4417_v49 = vrot.slane %v1286_v60, %v4371_v2  ;;  %v4420_v7 = vrot.slane %v3345_v62, %v4371_v2  ;;  %v771_v8 = vpop.permute.xlu1 %770  ;;  %v765_v10 = vpop.permute.xlu0 %764 }
 0x20c   : > { %v806_v11 = vcombine.low %v782_v63, %v798_v3  ;;  %v807_v12 = vcombine.high %v782_v63, %v798_v3  ;;  %v822_v13 = vcombine.low %v789_v1, %v805_v4  ;;  %v823_v14 = vcombine.high %v789_v1, %v805_v4 }
 0x20d   : > { %v858_v15 = vcombine.low %v759_v51, %v771_v8  ;;  %v859_v16 = vcombine.high %v759_v51, %v771_v8  ;;  %v842_v17 = vcombine.low %v4350_v52, %v765_v10  ;;  %v843_v18 = vcombine.high %v4350_v52, %v765_v10 }
 0x20e   : > { %v814_v19 = vrot.slane %v806_v11, %v4374_v9  ;;  %v821_v20 = vrot.slane %v807_v12, %v4374_v9  ;;  %v830_v21 = vrot.slane %v822_v13, %v4374_v9  ;;  %v837_v22 = vrot.slane %v823_v14, %v4374_v9 }
 0x20f   : > { %v866_v23 = vrot.slane %v858_v15, %v4371_v2  ;;  %v873_v24 = vrot.slane %v859_v16, %v4371_v2  ;;  %v850_v25 = vrot.slane %v842_v17, %v4371_v2  ;;  %v857_v26 = vrot.slane %v843_v18, %v4371_v2 }
 0x210   : > { %v910_v27 = vcombine.low %v814_v19, %v821_v20  ;;  %v3338_v28 = vcombine.high %v814_v19, %v821_v20  ;;  %v926_v52 = vcombine.low %v830_v21, %v837_v22  ;;  %v3339_v29 = vcombine.high %v830_v21, %v837_v22 }
 0x211   : > { %v874_v30 = vcombine.low %v850_v25, %v866_v23  ;;  %v875_v31 = vcombine.high %v850_v25, %v866_v23  ;;  %v890_v32 = vcombine.low %v857_v26, %v873_v24  ;;  %v891_v33 = vcombine.high %v857_v26, %v873_v24 }
 0x212   : > { %v917_v34 = vrot.slane %v910_v27, %v4371_v2  ;;  %v925_v35 = vrot.slane %v3338_v28, %v4371_v2  ;;  %v933_v36 = vrot.slane %v926_v52, %v4371_v2  ;;  %v941_v37 = vrot.slane %v3339_v29, %v4371_v2 }
 0x213   : > { %v882_v38 = vrot.slane %v874_v30, %v4374_v9  ;;  %v889_v39 = vrot.slane %v875_v31, %v4374_v9  ;;  %v898_v40 = vrot.slane %v890_v32, %v4374_v9  ;;  %v905_v41 = vrot.slane %v891_v33, %v4374_v9 }
 0x214   : > { %v1302_v46 = vcombine.low %v4411_v5, %v4414_v6  ;;  %v1318_v47 = vcombine.low %v4417_v49, %v4420_v7  ;;  %v1234_v48 = vcombine.low %v4389_v42, %v4392_v43  ;;  %v1250_v50 = vcombine.low %v4395_v44, %v4398_v45 }
 0x215   : > { %v978_v51 = vcombine.low %v882_v38, %v889_v39  ;;  %v3340_v53 = vcombine.high %v882_v38, %v889_v39  ;;  %v994_v54 = vcombine.low %v898_v40, %v905_v41  ;;  %v3341_v55 = vcombine.high %v898_v40, %v905_v41  ;;  %v4500_v38 = vpop.f32.mrf.mxu1  ;;  %v553_v39 = vld [vmem:[%s488_s19] sm:$0x1]  ;;  %s4828_s19 = sld [smem:[#allocation24_spill]] }
 0x216   : > { %v1310_v56 = vrot.slane %v1302_v46, %v4374_v9  ;;  %v1326_v57 = vrot.slane %v1318_v47, %v4374_v9  ;;  %v1242_v58 = vrot.slane %v1234_v48, %v4374_v9  ;;  %v1258_v59 = vrot.slane %v1250_v50, %v4374_v9  ;;  %1342 = vrot.lane.b32.xlu1 %v4500_v38, %s4051_s30 }
 0x217   : > { %v985_v60 = vrot.slane %v978_v51, %v4371_v2  ;;  %v993_v62 = vrot.slane %v3340_v53, %v4371_v2  ;;  %v1001_v63 = vrot.slane %v994_v54, %v4371_v2  ;;  %v1009_v1 = vrot.slane %v3341_v55, %v4371_v2  ;;  %v4509_v48 = vpop.f32.mrf.mxu1 }
 0x218   : > { %v1334_v3 = vcombine.low %v1310_v56, %v1326_v57  ;;  %v942_v4 = vcombine.low %v917_v34, %v925_v35  ;;  %v1266_v11 = vcombine.low %v1242_v58, %v1258_v59  ;;  %v958_v13 = vcombine.low %v933_v36, %v941_v37 }
 0x219   : > { %v1010_v8 = vcombine.low %v985_v60, %v993_v62  ;;  %v1026_v10 = vcombine.low %v1001_v63, %v1009_v1  ;;  %v1335_v17 = vcombine.high %v1310_v56, %v1326_v57  ;;  %v1303_v20 = vcombine.high %v4411_v5, %v4414_v6 }
 0x21a   : > { %3532 = vmatprep.subr.msk.mxu1 %vm1630_vm0, %v1334_v3  ;;  %v950_v12 = vrot.slane %v942_v4, %v4374_v9  ;;  %v966_v16 = vrot.slane %v958_v13, %v4374_v9  ;;  %v1319_v21 = vcombine.high %v4417_v49, %v4420_v7  ;;  %v1267_v22 = vcombine.high %v1242_v58, %v1258_v59 }
 0x21b   : > { %3533 = vmatpush3.xpose.msk.msra.mxu1 %vm1630_vm0, %v1334_v3  ;;  %v1018_v14 = vrot.slane %v1010_v8, %v4374_v9  ;;  %v1034_v15 = vrot.slane %v1026_v10, %v4374_v9  ;;  %v943_v24 = vcombine.high %v917_v34, %v925_v35  ;;  %v959_v25 = vcombine.high %v933_v36, %v941_v37  ;;  %p4830_p1 = scmp.ne.s32.totalorder %s4828_s19, 0 }
 0x21c   : > { %3534 = vmatprep.subr.msk.mxu1 %vm1630_vm0, %v1266_v11  ;;  %v974_v18 = vcombine.low %v950_v12, %v966_v16  ;;  %v975_v23 = vcombine.high %v950_v12, %v966_v16  ;;  %v1317_v26 = vrot.slane %v1303_v20, %v4374_v9  ;;  %v1333_v27 = vrot.slane %v1319_v21, %v4374_v9 }
 0x21d   : > { %v1042_v19 = vcombine.low %v1018_v14, %v1034_v15  ;;  %v1235_v5 = vcombine.high %v4389_v42, %v4392_v43  ;;  %v1251_v6 = vcombine.high %v4395_v44, %v4398_v45  ;;  %v957_v49 = vrot.slane %v943_v24, %v4374_v9 }
 0x21e   : > { %3536 = vmatprep.mubr.msk.f32.mxu1 %vm1630_vm0, %v974_v18  ;;  %v973_v7 = vrot.slane %v959_v25, %v4374_v9  ;;  %v1336_v28 = vcombine.low %v1317_v26, %v1333_v27  ;;  %v1011_v42 = vcombine.high %v985_v60, %v993_v62  ;;  %v1027_v43 = vcombine.high %v1001_v63, %v1009_v1 }
 0x21f   : > { %3535 = vmatpush3.xpose.msk.msra.mxu1 %vm1630_vm0, %v1266_v11  ;;  %v1249_v52 = vrot.slane %v1235_v5, %v4374_v9  ;;  %v1265_v29 = vrot.slane %v1251_v6, %v4374_v9  ;;  %v1043_v44 = vcombine.high %v1018_v14, %v1034_v15  ;;  %v1337_v33 = vcombine.high %v1317_v26, %v1333_v27 }
 0x220   : > { %3539 = vmatprep.subr.msk.mxu1 %vm1630_vm0, %v1335_v17  ;;  %v976_v45 = vcombine.low %v957_v49, %v973_v7  ;;  %v1025_v31 = vrot.slane %v1011_v42, %v4374_v9  ;;  %v1041_v32 = vrot.slane %v1027_v43, %v4374_v9  ;;  %v977_v35 = vcombine.high %v957_v49, %v973_v7 }
 0x221   : > { %v1268_v30 = vcombine.low %v1249_v52, %v1265_v29  ;;  %v1269_v36 = vcombine.high %v1249_v52, %v1265_v29  ;;  %vm1987_vm1 = vcmp.ne.f32.partialorder %v553_v39, 0.0  ;;  %v1991_v40 = vsub.s32 0, %v4368_v61 }
 0x222   : > { %3537 = vmatmul.mubr.msk.f32.vlgmr.msra.gmra.mxu1 %vm1630_vm0, %v1042_v19  ;;  %v1044_v34 = vcombine.low %v1025_v31, %v1041_v32  ;;  %v1045_v37 = vcombine.high %v1025_v31, %v1041_v32  ;;  %v4055_v41 = vmov 0  }
 0x223   : > { %3540 = vmatpush3.xpose.msk.msra.mxu1 %vm1630_vm0, %v1335_v17  ;;  %3543 = vmatprep.mubr.msk.f32.mxu1 %vm1630_vm0, %v975_v23  ;;  %v1988_v46 = vsel %vm1987_vm1, 1, %v4055_v41 }
 0x224   : > { %3541 = vmatprep.subr.msk.mxu1 %vm1630_vm0, %v1267_v22  ;;  %v1992_v47 = vrot.slane %v1988_v46, %v1991_v40 }
 0x226   : > { %vm1993_vm2 = vcmp.eq.s32.totalorder %v1992_v47, 1 }
 0x227   : > { %3542 = vmatpush3.xpose.msk.msra.mxu1 %vm1630_vm0, %v1267_v22 }
 0x228   : > { %3546 = vmatprep.subr.msk.mxu1 %vm1630_vm0, %v1336_v28 }
 0x22a   : > { %3544 = vmatmul.mubr.msk.f32.vlgmr.msra.gmra.mxu1 %vm1630_vm0, %v1043_v44 }
 0x22b   : > { %3547 = vmatpush3.xpose.msk.msra.mxu1 %vm1630_vm0, %v1336_v28  ;;  %3550 = vmatprep.mubr.msk.f32.mxu1 %vm1630_vm0, %v976_v45 }
 0x22c   : > { %3548 = vmatprep.subr.msk.mxu1 %vm1630_vm0, %v1268_v30 }
 0x22f   : > { %3549 = vmatpush3.xpose.msk.msra.mxu1 %vm1630_vm0, %v1268_v30 }
 0x230   : > { %3553 = vmatprep.subr.msk.mxu1 %vm1630_vm0, %v1337_v33 }
 0x232   : > { %3551 = vmatmul.mubr.msk.f32.vlgmr.msra.gmra.mxu1 %vm1630_vm0, %v1044_v34 }
 0x233   : > { %3554 = vmatpush3.xpose.msk.msra.mxu1 %vm1630_vm0, %v1337_v33  ;;  %3557 = vmatprep.mubr.msk.f32.mxu1 %vm1630_vm0, %v977_v35 }
 0x234   : > { %3555 = vmatprep.subr.msk.mxu1 %vm1630_vm0, %v1269_v36 }
 0x237   : > { %3556 = vmatpush3.xpose.msk.msra.mxu1 %vm1630_vm0, %v1269_v36 }
 0x23a   : > { %3558 = vmatmul.mubr.msk.f32.vlgmr.msra.gmra.mxu1 %vm1630_vm0, %v1045_v37 }
 0x288   : > { %v1343_v7 = vpop.permute.xlu1 %1342 }
 0x2e2   : > { %v3538_v50 = vpop.f32.mrf.mxu1 }
 0x2e3   : > { %v1980_v51 = vmul.f32 0.17677669, %v3538_v50 }
 0x2e4   : > { %v1709_v53 = vpop.f32.mrf.mxu1 }
 0x2e5   : > { %v1979_v54 = vmul.f32 0.17677669, %v1709_v53  ;;  %v1995_v55 = vsel %vm1993_vm2, %v1980_v51, -1e+09 }
 0x2e6   : > { %v2006_v56 = vsel %vm2002_vm3, %v1995_v55, -inf }
 0x2e7   : > { %2007 = vmax.xlane.f32.xlu0 %v2006_v56  ;;  %v1994_v57 = vsel %vm1993_vm2, %v1979_v54, -1e+09 }
 0x2e8   : > { %v2003_v59 = vsel %vm2002_vm3, %v1994_v57, -inf }
 0x2ea   : > { %v3545_v58 = vpop.f32.mrf.mxu1 }
 0x2eb   : > { %v1982_v60 = vmul.f32 0.17677669, %v3545_v58  ;;  %2004 = vmax.xlane.f32.xlu0 %v2003_v59 }
 0x2ec   : > { %v1796_v62 = vpop.f32.mrf.mxu1 }
 0x2ed   : > { %v1981_v63 = vmul.f32 0.17677669, %v1796_v62  ;;  %v1997_v1 = vsel %vm1993_vm2, %v1982_v60, -1e+09 }
 0x2ee   : > { %v2012_v3 = vsel %vm2002_vm3, %v1997_v1, -inf }
 0x2ef   : > { %2013 = vmax.xlane.f32.xlu0 %v2012_v3  ;;  %v1996_v4 = vsel %vm1993_vm2, %v1981_v63, -1e+09 }
 0x2f0   : > { %v2009_v8 = vsel %vm2002_vm3, %v1996_v4, -inf }
 0x2f1   : > { %2010 = vmax.xlane.f32.xlu1 %v2009_v8 }
 0x2f2   : > { %v3552_v10 = vpop.f32.mrf.mxu1 }
 0x2f3   : > { %v1984_v11 = vmul.f32 0.17677669, %v3552_v10 }
 0x2f4   : > { %v1883_v12 = vpop.f32.mrf.mxu1 }
 0x2f5   : > { %v1983_v13 = vmul.f32 0.17677669, %v1883_v12  ;;  %v1999_v14 = vsel %vm1993_vm2, %v1984_v11, -1e+09 }
 0x2f6   : > { %v2018_v15 = vsel %vm2002_vm3, %v1999_v14, -inf }
 0x2f7   : > { %2019 = vmax.xlane.f32.xlu1 %v2018_v15  ;;  %v1998_v16 = vsel %vm1993_vm2, %v1983_v13, -1e+09 }
 0x2f8   : > { %v2015_v18 = vsel %vm2002_vm3, %v1998_v16, -inf }
 0x2fa   : > { %v3559_v17 = vpop.f32.mrf.mxu1 }
 0x2fb   : > { %v1986_v19 = vmul.f32 0.17677669, %v3559_v17  ;;  %2016 = vmax.xlane.f32.xlu1 %v2015_v18 }
 0x2fc   : > { %v1970_v20 = vpop.f32.mrf.mxu1 }
 0x2fd   : > { %v1985_v21 = vmul.f32 0.17677669, %v1970_v20  ;;  %v2001_v22 = vsel %vm1993_vm2, %v1986_v19, -1e+09 }
 0x2fe   : > { %v2024_v23 = vsel %vm2002_vm3, %v2001_v22, -inf }
 0x2ff   : > { %2025 = vmax.xlane.f32.xlu0 %v2024_v23  ;;  %v2000_v24 = vsel %vm1993_vm2, %v1985_v21, -1e+09 }
 0x300   : > { %v2021_v25 = vsel %vm2002_vm3, %v2000_v24, -inf }
 0x303   : > { %2022 = vmax.xlane.f32.xlu0 %v2021_v25 }
 0x30c   : > { %1354 = vrot.lane.b32.xlu1 %v4500_v38, %s4052_s9 }
 0x310   : > { %1340 = vrot.lane.b32.xlu1 %v4509_v48, %s4051_s30 }
 0x319   : > { %1348 = vrot.lane.b32.xlu0 %v4500_v38, %s4050_s14 }
 0x370   : > { %v2008_v26 = vpop.xlane.xlu0 %2007 }
 0x371   : > { %v2028_v27 = vsub.f32 %v1995_v55, %v2008_v26 }
 0x373   : > { %v2037_v5 = vmul.f32 1.442695, %v2028_v27 }
 0x374   : > { %v2005_v6 = vpop.xlane.xlu0 %2004 }
 0x375   : > { %3745 = vpow2.f32 %v2037_v5  ;;  %v2027_v49 = vsub.f32 %v1994_v57, %v2005_v6 }
 0x377   : > { %v2035_v28 = vmul.f32 1.442695, %v2027_v49 }
 0x378   : > { %v2014_v52 = vpop.xlane.xlu0 %2013 }
 0x379   : > { %3747 = vpow2.f32 %v2035_v28  ;;  %v2030_v29 = vsub.f32 %v1997_v1, %v2014_v52 }
 0x37a   : > { %v2011_v42 = vpop.xlane.xlu1 %2010 }
 0x37b   : > { %v2041_v43 = vmul.f32 1.442695, %v2030_v29  ;;  %v2029_v44 = vsub.f32 %v1996_v4, %v2011_v42 }
 0x37d   : > { %3749 = vpow2.f32 %v2041_v43  ;;  %v2039_v45 = vmul.f32 1.442695, %v2029_v44 }
 0x37f   : > { %3751 = vpow2.f32 %v2039_v45 }
 0x380   : > { %v2020_v30 = vpop.xlane.xlu1 %2019 }
 0x381   : > { %v2032_v31 = vsub.f32 %v1999_v14, %v2020_v30 }
 0x382   : > { %v4533_v32 = vpop.eup %3745 }
 0x383   : > { %v2045_v33 = vmul.f32 1.442695, %v2032_v31  ;;  %v2054_v34 = vsel %vm2002_vm3, %v4533_v32, 0.0 }
 0x384   : > { %v2017_v35 = vpop.xlane.xlu1 %2016  ;;  %2055 = vadd.xlane.f32.xlu1 %v2054_v34 }
 0x385   : > { %3753 = vpow2.f32 %v2045_v33  ;;  %v2031_v36 = vsub.f32 %v1998_v16, %v2017_v35 }
 0x386   : > { %v4537_v37 = vpop.eup %3747 }
 0x387   : > { %v2043_v39 = vmul.f32 1.442695, %v2031_v36  ;;  %v2051_v41 = vsel %vm2002_vm3, %v4537_v37, 0.0 }
 0x388   : > { %v2026_v46 = vpop.xlane.xlu0 %2025  ;;  %2052 = vadd.xlane.f32.xlu1 %v2051_v41  ;;  %v1355_v51 = vpop.permute.xlu1 %1354 }
 0x389   : > { %3755 = vpow2.f32 %v2043_v39  ;;  %v2034_v47 = vsub.f32 %v2001_v22, %v2026_v46  ;;  %v1442_v58 = vcombine.low %v1343_v7, %v1355_v51  ;;  %v1443_v59 = vcombine.high %v1343_v7, %v1355_v51 }
 0x38a   : > { %v4541_v50 = vpop.eup %3749 }
 0x38b   : > { %v2049_v53 = vmul.f32 1.442695, %v2034_v47  ;;  %v2060_v54 = vsel %vm2002_vm3, %v4541_v50, 0.0  ;;  %v1450_v8 = vrot.slane %v1442_v58, %v4371_v2  ;;  %v1457_v10 = vrot.slane %v1443_v59, %v4371_v2 }
 0x38c   : > { %v4545_v55 = vpop.eup %3751  ;;  %v2023_v56 = vpop.xlane.xlu0 %2022  ;;  %2061 = vadd.xlane.f32.xlu0 %v2060_v54 }
 0x38d   : > { %3757 = vpow2.f32 %v2049_v53  ;;  %v2033_v57 = vsub.f32 %v2000_v24, %v2023_v56  ;;  %v2057_v62 = vsel %vm2002_vm3, %v4545_v55, 0.0  ;;  %v1341_v46 = vpop.permute.xlu1 %1340 }
 0x38f   : > { %v2047_v60 = vmul.f32 1.442695, %v2033_v57 }
 0x390   : > { %v1349_v63 = vpop.permute.xlu0 %1348  ;;  %2058 = vadd.xlane.f32.xlu0 %v2057_v62 }
 0x391   : > { %3759 = vpow2.f32 %v2047_v60  ;;  %v1426_v1 = vcombine.low %v4500_v38, %v1349_v63  ;;  %v1427_v3 = vcombine.high %v4500_v38, %v1349_v63 }
 0x392   : > { %v4551_v4 = vpop.eup %3753 }
 0x393   : > { %v1434_v11 = vrot.slane %v1426_v1, %v4371_v2  ;;  %v1441_v12 = vrot.slane %v1427_v3, %v4371_v2  ;;  %v2066_v13 = vsel %vm2002_vm3, %v4551_v4, 0.0 }
 0x394   : > { %2067 = vadd.xlane.f32.xlu1 %v2066_v13 }
 0x395   : > { %v1458_v14 = vcombine.low %v1434_v11, %v1450_v8  ;;  %v1459_v15 = vcombine.high %v1434_v11, %v1450_v8  ;;  %v1474_v16 = vcombine.low %v1441_v12, %v1457_v10  ;;  %v1475_v17 = vcombine.high %v1441_v12, %v1457_v10 }
 0x396   : > { %v4559_v18 = vpop.eup %3755 }
 0x397   : > { %v1466_v38 = vrot.slane %v1458_v14, %v4374_v9  ;;  %v1473_v19 = vrot.slane %v1459_v15, %v4374_v9  ;;  %v1482_v20 = vrot.slane %v1474_v16, %v4374_v9  ;;  %v1489_v21 = vrot.slane %v1475_v17, %v4374_v9 }
 0x398   : > { %v2063_v22 = vsel %vm2002_vm3, %v4559_v18, 0.0 }
 0x399   : > { %v1562_v23 = vcombine.low %v1466_v38, %v1473_v19  ;;  %v3348_v24 = vcombine.high %v1466_v38, %v1473_v19  ;;  %v1578_v25 = vcombine.low %v1482_v20, %v1489_v21  ;;  %v3349_v26 = vcombine.high %v1482_v20, %v1489_v21  ;;  %2064 = vadd.xlane.f32.xlu1 %v2063_v22 }
 0x39a   : > { %v4567_v27 = vpop.eup %3757 }
 0x39b   : > { %v2072_v5 = vsel %vm2002_vm3, %v4567_v27, 0.0  ;;  %v1569_v6 = vrot.slane %v1562_v23, %v4371_v2  ;;  %v1577_v49 = vrot.slane %v3348_v24, %v4371_v2  ;;  %v1585_v7 = vrot.slane %v1578_v25, %v4371_v2 }
 0x39c   : > { %2073 = vadd.xlane.f32.xlu0 %v2072_v5  ;;  %v1593_v28 = vrot.slane %v3349_v26, %v4371_v2 }
 0x39d   : > { %v1594_v52 = vcombine.low %v1569_v6, %v1577_v49  ;;  %v1595_v29 = vcombine.high %v1569_v6, %v1577_v49 }
 0x39e   : > { %v4575_v42 = vpop.eup %3759  ;;  %v1610_v43 = vcombine.low %v1585_v7, %v1593_v28  ;;  %v1611_v44 = vcombine.high %v1585_v7, %v1593_v28 }
 0x39f   : > { %v2069_v45 = vsel %vm2002_vm3, %v4575_v42, 0.0  ;;  %v1602_v30 = vrot.slane %v1594_v52, %v4374_v9  ;;  %v1609_v31 = vrot.slane %v1595_v29, %v4374_v9 }
 0x3a0   : > { %2070 = vadd.xlane.f32.xlu0 %v2069_v45  ;;  %v1618_v33 = vrot.slane %v1610_v43, %v4374_v9  ;;  %v1625_v34 = vrot.slane %v1611_v44, %v4374_v9 }
 0x3a2   : > { %v1626_v35 = vcombine.low %v1602_v30, %v1618_v33  ;;  %v1627_v36 = vcombine.high %v1602_v30, %v1618_v33  ;;  %v4583_v39 = vcombine.low %v1609_v31, %v1625_v34  ;;  %v4585_v41 = vcombine.high %v1609_v31, %v1625_v34 }
 0x3a4   : > { %3560 = vmatprep.subr.mxu0 %v1626_v35  ;;  %3567 = vmatprep.subr.mxu1 %v1627_v36 }
 0x3a5   : > { %3561 = vmatpush3.msra.mxu0 %v1626_v35  ;;  %3568 = vmatpush3.msra.mxu1 %v1627_v36 }
 0x3aa   : > { %1352 = vrot.lane.b32.xlu1 %v4509_v48, %s4052_s9 }
 0x3b6   : > { %1346 = vrot.lane.b32.xlu0 %v4509_v48, %s4050_s14 }
 0x40d   : > { %v2056_v47 = vpop.xlane.xlu1 %2055 }
 0x411   : > { %v2053_v51 = vpop.xlane.xlu1 %2052 }
 0x412   : > { %3761 = vrcp.f32 %v2053_v51 }
 0x415   : > { %v2062_v53 = vpop.xlane.xlu0 %2061 }
 0x419   : > { %v2059_v54 = vpop.xlane.xlu0 %2058 }
 0x41a   : > { %3763 = vrcp.f32 %v2059_v54 }
 0x41b   : > { %3765 = vrcp.f32 %v2056_v47 }
 0x41c   : > { %3767 = vrcp.f32 %v2062_v53 }
 0x41d   : > { %v2068_v56 = vpop.xlane.xlu1 %2067 }
 0x41e   : > { %3769 = vrcp.f32 %v2068_v56 }
 0x41f   : > { %v3762_v57 = vpop.eup %3761 }
 0x420   : > { %v2083_v58 = vmul.f32 %v3762_v57, %v4537_v37 }
 0x422   : > { %3564 = vmatprep.mubr.msk.f32.mxu0 %vm2002_vm3, %v2083_v58  ;;  %v2065_v59 = vpop.xlane.xlu1 %2064 }
 0x423   : > { %3771 = vrcp.f32 %v2065_v59 }
 0x425   : > { %v2074_v60 = vpop.xlane.xlu0 %2073 }
 0x426   : > { %v1353_v1 = vpop.permute.xlu1 %1352 }
 0x427   : > { %v3764_v62 = vpop.eup %3763  ;;  %v1374_v8 = vcombine.low %v1341_v46, %v1353_v1  ;;  %v1375_v10 = vcombine.high %v1341_v46, %v1353_v1  ;;  %v2726_v1 = vld [vmem:[#allocation8 + $0x38] sm:$0xff] }
 0x428   : > { %v2085_v63 = vmul.f32 %v3764_v62, %v4545_v55  ;;  %v3766_v28 = vpop.eup %3765  ;;  %v2728_v62 = vld [vmem:[#allocation8 + $0x48] sm:$0xff] }
 0x429   : > { %v2071_v3 = vpop.xlane.xlu0 %2070  ;;  %v1382_v13 = vrot.slane %v1374_v8, %v4371_v2  ;;  %v1389_v14 = vrot.slane %v1375_v10, %v4371_v2  ;;  %v3768_v43 = vpop.eup %3767  ;;  %v2084_v46 = vmul.f32 %v3766_v28, %v4533_v32  ;;  %v2724_v8 = vld [vmem:[#allocation8 + $0x28] sm:$0xff]  ;;  %v2723_v10 = vld [vmem:[#allocation8 + $0x20] sm:$0xff] }
 0x42a   : > { %3571 = vmatprep.mubr.msk.f32.mxu1 %vm2002_vm3, %v2085_v63  ;;  %3773 = vrcp.f32 %v2071_v3  ;;  %v2086_v51 = vmul.f32 %v3768_v43, %v4541_v50  ;;  %v2727_v63 = vld [vmem:[#allocation8 + $0x40] sm:$0xff]  ;;  %v2725_v3 = vld [vmem:[#allocation8 + $0x30] sm:$0xff] }
 0x42b   : > { %3775 = vrcp.f32 %v2074_v60  ;;  %v3770_v44 = vpop.eup %3769  ;;  %v2731_v60 = vld [vmem:[#allocation8 + $0x60] sm:$0xff] }
 0x42d   : > { %v1347_v11 = vpop.permute.xlu0 %1346 }
 0x42e   : > { %v1358_v12 = vcombine.low %v4509_v48, %v1347_v11  ;;  %v1359_v37 = vcombine.high %v4509_v48, %v1347_v11 }
 0x430   : > { %v1366_v55 = vrot.slane %v1358_v12, %v4371_v2  ;;  %v1373_v15 = vrot.slane %v1359_v37, %v4371_v2  ;;  %v3772_v34 = vpop.eup %3771 }
 0x431   : > { %v2087_v57 = vmul.f32 %v3772_v34, %v4559_v18  ;;  %v2088_v18 = vmul.f32 %v3770_v44, %v4551_v4  ;;  %v2730_v4 = vld [vmem:[#allocation8 + $0x58] sm:$0xff] }
 0x432   : > { %v1390_v16 = vcombine.low %v1366_v55, %v1382_v13  ;;  %v1391_v17 = vcombine.high %v1366_v55, %v1382_v13  ;;  %v1406_v38 = vcombine.low %v1373_v15, %v1389_v14  ;;  %v1407_v19 = vcombine.high %v1373_v15, %v1389_v14 }
 0x434   : > { %v1398_v20 = vrot.slane %v1390_v16, %v4374_v9  ;;  %v1405_v21 = vrot.slane %v1391_v17, %v4374_v9  ;;  %v1414_v48 = vrot.slane %v1406_v38, %v4374_v9  ;;  %v1421_v22 = vrot.slane %v1407_v19, %v4374_v9 }
 0x436   : > { %v1494_v23 = vcombine.low %v1398_v20, %v1405_v21  ;;  %v3346_v24 = vcombine.high %v1398_v20, %v1405_v21  ;;  %v1510_v25 = vcombine.low %v1414_v48, %v1421_v22  ;;  %v3347_v26 = vcombine.high %v1414_v48, %v1421_v22 }
 0x437   : > { %v3774_v47 = vpop.eup %3773 }
 0x438   : > { %v1501_v5 = vrot.slane %v1494_v23, %v4371_v2  ;;  %v1509_v6 = vrot.slane %v3346_v24, %v4371_v2  ;;  %v1517_v49 = vrot.slane %v1510_v25, %v4371_v2  ;;  %v1525_v7 = vrot.slane %v3347_v26, %v4371_v2  ;;  %v3776_v56 = vpop.eup %3775 }
 0x439   : > { %v2089_v32 = vmul.f32 %v3774_v47, %v4575_v42  ;;  %v2090_v59 = vmul.f32 %v3776_v56, %v4567_v27  ;;  %v2734_v42 = vld [vmem:[#allocation8 + $0x78] sm:$0xff]  ;;  %v2729_v27 = vld [vmem:[#allocation8 + $0x50] sm:$0xff] }
 0x43a   : > { %v1526_v52 = vcombine.low %v1501_v5, %v1509_v6  ;;  %v1542_v29 = vcombine.low %v1517_v49, %v1525_v7  ;;  %v1527_v31 = vcombine.high %v1501_v5, %v1509_v6  ;;  %v1543_v33 = vcombine.high %v1517_v49, %v1525_v7 }
 0x43c   : > { %v1534_v45 = vrot.slane %v1526_v52, %v4374_v9  ;;  %v1550_v30 = vrot.slane %v1542_v29, %v4374_v9  ;;  %v1541_v53 = vrot.slane %v1527_v31, %v4374_v9  ;;  %v1557_v54 = vrot.slane %v1543_v33, %v4374_v9 }
 0x43e   : > { %v1558_v35 = vcombine.low %v1534_v45, %v1550_v30  ;;  %v1559_v36 = vcombine.high %v1534_v45, %v1550_v30  ;;  %v1560_v50 = vcombine.low %v1541_v53, %v1557_v54  ;;  %v1561_v58 = vcombine.high %v1541_v53, %v1557_v54 }
 0x440   : > { %3562 = vmatprep.subr.mxu0 %v1558_v35  ;;  %3569 = vmatprep.subr.mxu1 %v1559_v36 }
 0x441   : > { %3563 = vmatpush3.msra.mxu0 %v1558_v35  ;;  %3570 = vmatpush3.msra.mxu1 %v1559_v36 }
 0x442   : > { %3565 = vmatmul.mubr.msk.f32.vlgmr.msra.gmra.mxu0 %vm2002_vm3, %v2084_v46  ;;  %3572 = vmatmul.mubr.msk.f32.vlgmr.msra.gmra.mxu1 %vm2002_vm3, %v2086_v51 }
 0x443   : > { %3574 = vmatprep.subr.mxu0 %v4583_v39  ;;  %3581 = vmatprep.subr.mxu1 %v4585_v41 }
 0x444   : > { %3575 = vmatpush3.msra.mxu0 %v4583_v39  ;;  %3578 = vmatprep.mubr.msk.f32.mxu0 %vm2002_vm3, %v2087_v57  ;;  %v2733_v39 = vld [vmem:[#allocation8 + $0x70] sm:$0xff] }
 0x445   : > { %3582 = vmatpush3.msra.mxu1 %v4585_v41  ;;  %3585 = vmatprep.mubr.msk.f32.mxu1 %vm2002_vm3, %v2089_v32  ;;  %v2732_v41 = vld [vmem:[#allocation8 + $0x68] sm:$0xff] }
 0x446   : > { %3576 = vmatprep.subr.mxu0 %v1560_v50  ;;  %3583 = vmatprep.subr.mxu1 %v1561_v58 }
 0x447   : > { %3577 = vmatpush3.msra.mxu0 %v1560_v50  ;;  %3584 = vmatpush3.msra.mxu1 %v1561_v58 }
 0x448   : > { %3579 = vmatmul.mubr.msk.f32.vlgmr.msra.gmra.mxu0 %vm2002_vm3, %v2088_v18  ;;  %3586 = vmatmul.mubr.msk.f32.vlgmr.msra.gmra.mxu1 %vm2002_vm3, %v2090_v59 }
 0x449   : > { %2968 = vmatprep.mubr.f32.mxu1 %v4049_v0  ;;  %3588 = vmatprep.subr.mxu0 %v2734_v42 }
 0x44a   : > { %3589 = vmatpush3.msra.mxu0 %v2734_v42 }
 0x44b   : > { %3590 = vmatprep.subr.mxu0 %v2733_v39 }
 0x44c   : > { %3591 = vmatpush3.msra.mxu0 %v2733_v39 }
 0x44d   : > { %3592 = vmatprep.subr.mxu0 %v2732_v41 }
 0x44e   : > { %3593 = vmatpush3.msra.mxu0 %v2732_v41 }
 0x44f   : > { %3594 = vmatprep.subr.mxu0 %v2731_v60 }
 0x450   : > { %3595 = vmatpush3.msra.mxu0 %v2731_v60 }
 0x451   : > { %3596 = vmatprep.subr.mxu0 %v2730_v4 }
 0x452   : > { %3597 = vmatpush3.msra.mxu0 %v2730_v4 }
 0x453   : > { %3598 = vmatprep.subr.mxu0 %v2729_v27 }
 0x454   : > { %3599 = vmatpush3.msra.mxu0 %v2729_v27 }
 0x455   : > { %3600 = vmatprep.subr.mxu0 %v2728_v62 }
 0x456   : > { %3601 = vmatpush3.msra.mxu0 %v2728_v62 }
 0x457   : > { %3602 = vmatprep.subr.mxu0 %v2727_v63 }
 0x458   : > { %3603 = vmatpush3.msra.mxu0 %v2727_v63 }
 0x459   : > { %3604 = vmatprep.subr.mxu0 %v2726_v1 }
 0x45a   : > { %3605 = vmatpush3.msra.mxu0 %v2726_v1 }
 0x45b   : > { %3606 = vmatprep.subr.mxu0 %v2725_v3 }
 0x45c   : > { %3607 = vmatpush3.msra.mxu0 %v2725_v3  ;;  %v2722_v3 = vld [vmem:[#allocation8 + $0x18] sm:$0xff] }
 0x45d   : > { %3608 = vmatprep.subr.mxu0 %v2724_v8 }
 0x45e   : > { %3609 = vmatpush3.msra.mxu0 %v2724_v8  ;;  %v2721_v8 = vld [vmem:[#allocation8 + $0x10] sm:$0xff] }
 0x45f   : > { %3610 = vmatprep.subr.mxu0 %v2723_v10 }
 0x460   : > { %3611 = vmatpush3.msra.mxu0 %v2723_v10 }
 0x461   : > { %3612 = vmatprep.subr.mxu0 %v2722_v3 }
 0x462   : > { %3613 = vmatpush3.msra.mxu0 %v2722_v3 }
 0x463   : > { %3614 = vmatprep.subr.mxu0 %v2721_v8 }
 0x464   : > { %3615 = vmatpush3.msra.mxu0 %v2721_v8 }
 0x502   : > { %v3566_v11 = vpop.f32.mrf.mxu0  ;;  %v3573_v12 = vpop.f32.mrf.mxu1 }
 0x504   : > { %v2163_v37 = vpop.f32.mrf.mxu0  ;;  %v2244_v13 = vpop.f32.mrf.mxu1 }
 0x508   : > { %v3580_v14 = vpop.f32.mrf.mxu0  ;;  %v3587_v55 = vpop.f32.mrf.mxu1 }
 0x509   : > { %v2483_v15 = vcombine.low %v3566_v11, %v3580_v14  ;;  %v2484_v16 = vcombine.high %v3566_v11, %v3580_v14  ;;  %v2499_v17 = vcombine.low %v3573_v12, %v3587_v55  ;;  %v2500_v38 = vcombine.high %v3573_v12, %v3587_v55 }
 0x50a   : > { %v2325_v19 = vpop.f32.mrf.mxu0  ;;  %v2406_v20 = vpop.f32.mrf.mxu1 }
 0x50b   : > { %v2491_v21 = vrot.slane %v2483_v15, %v4371_v2  ;;  %v2498_v48 = vrot.slane %v2484_v16, %v4371_v2  ;;  %v2507_v22 = vrot.slane %v2499_v17, %v4371_v2  ;;  %v2514_v23 = vrot.slane %v2500_v38, %v4371_v2  ;;  %v2720_v16 = vld [vmem:[#allocation8 + $0x8] sm:$0xff] }
 0x50c   : > { %v2415_v24 = vcombine.low %v2163_v37, %v2325_v19  ;;  %v2416_v25 = vcombine.high %v2163_v37, %v2325_v19  ;;  %v2431_v26 = vcombine.low %v2244_v13, %v2406_v20  ;;  %v2432_v5 = vcombine.high %v2244_v13, %v2406_v20  ;;  %3616 = vmatprep.subr.mxu0 %v2720_v16 }
 0x50d   : > { %v2515_v6 = vcombine.low %v2491_v21, %v2507_v22  ;;  %v2516_v49 = vcombine.high %v2491_v21, %v2507_v22  ;;  %v2531_v7 = vcombine.low %v2498_v48, %v2514_v23  ;;  %v2532_v28 = vcombine.high %v2498_v48, %v2514_v23  ;;  %v2719_v48 = vld [vmem:[#allocation8] sm:$0xff]  ;;  %3617 = vmatpush3.msra.mxu0 %v2720_v16  ;;  %v2883_v16 = vld [vmem:[#allocation10 + $0xb8] sm:$0xff] }
 0x50e   : > { %v2423_v52 = vrot.slane %v2415_v24, %v4371_v2  ;;  %v2430_v29 = vrot.slane %v2416_v25, %v4371_v2  ;;  %v2439_v43 = vrot.slane %v2431_v26, %v4371_v2  ;;  %v2446_v44 = vrot.slane %v2432_v5, %v4371_v2  ;;  %3618 = vmatprep.subr.mxu0 %v2719_v48 }
 0x50f   : > { %v2523_v45 = vrot.slane %v2515_v6, %v4374_v9  ;;  %v2530_v30 = vrot.slane %v2516_v49, %v4374_v9  ;;  %v2539_v31 = vrot.slane %v2531_v7, %v4374_v9  ;;  %v2546_v33 = vrot.slane %v2532_v28, %v4374_v9  ;;  %3619 = vmatpush3.msra.mxu0 %v2719_v48  ;;  %v2877_v48 = vld [vmem:[#allocation10 + $0x88] sm:$0xff] }
 0x510   : > { %v2447_v34 = vcombine.low %v2423_v52, %v2439_v43  ;;  %v2448_v35 = vcombine.high %v2423_v52, %v2439_v43  ;;  %v2463_v36 = vcombine.low %v2430_v29, %v2446_v44  ;;  %v2464_v46 = vcombine.high %v2430_v29, %v2446_v44 }
 0x511   : > { %v2619_v47 = vcombine.low %v2523_v45, %v2530_v30  ;;  %v3376_v51 = vcombine.high %v2523_v45, %v2530_v30  ;;  %v2635_v53 = vcombine.low %v2539_v31, %v2546_v33  ;;  %v3377_v54 = vcombine.high %v2539_v31, %v2546_v33 }
 0x512   : > { %v2455_v56 = vrot.slane %v2447_v34, %v4374_v9  ;;  %v2462_v57 = vrot.slane %v2448_v35, %v4374_v9  ;;  %v2471_v32 = vrot.slane %v2463_v36, %v4374_v9  ;;  %v2478_v50 = vrot.slane %v2464_v46, %v4374_v9 }
 0x513   : > { %v2626_v58 = vrot.slane %v2619_v47, %v4371_v2  ;;  %v2634_v18 = vrot.slane %v3376_v51, %v4371_v2  ;;  %v2642_v59 = vrot.slane %v2635_v53, %v4371_v2  ;;  %v2650_v42 = vrot.slane %v3377_v54, %v4371_v2 }
 0x514   : > { %v2551_v39 = vcombine.low %v2455_v56, %v2462_v57  ;;  %v3374_v41 = vcombine.high %v2455_v56, %v2462_v57  ;;  %v2567_v60 = vcombine.low %v2471_v32, %v2478_v50  ;;  %v3375_v4 = vcombine.high %v2471_v32, %v2478_v50  ;;  %v3378_v57 = vld [vmem:[%s4767_s4] ss:$0 sm:$0xff] }
 0x515   : > { %v2652_v27 = vcombine.high %v2626_v58, %v2634_v18  ;;  %v2668_v62 = vcombine.high %v2642_v59, %v2650_v42  ;;  %v2651_v63 = vcombine.low %v2626_v58, %v2634_v18  ;;  %v2667_v1 = vcombine.low %v2642_v59, %v2650_v42  ;;  %v3793_v59 = vld [vmem:[%s4318_s2 + $0x8] sm:$0xff] }
 0x516   : > { %v2558_v10 = vrot.slane %v2551_v39, %v4371_v2  ;;  %v2566_v11 = vrot.slane %v3374_v41, %v4371_v2  ;;  %v2574_v12 = vrot.slane %v2567_v60, %v4371_v2  ;;  %v2582_v37 = vrot.slane %v3375_v4, %v4371_v2  ;;  %v3794_v39 = vld [vmem:[%s4318_s2] sm:$0xff] }
 0x517   : > { %v2666_v13 = vrot.slane %v2652_v27, %v4374_v9  ;;  %v2682_v14 = vrot.slane %v2668_v62, %v4374_v9  ;;  %v2659_v55 = vrot.slane %v2651_v63, %v4374_v9  ;;  %v2675_v15 = vrot.slane %v2667_v1, %v4374_v9  ;;  %v2891_v60 = vld [vmem:[#allocation10 + $0xf8] sm:$0xff]  ;;  %v2890_v4 = vld [vmem:[#allocation10 + $0xf0] sm:$0xff]  ;;  %v2889_v27 = vld [vmem:[#allocation10 + $0xe8] sm:$0xff] }
 0x518   : > { %v2584_v17 = vcombine.high %v2558_v10, %v2566_v11  ;;  %v2600_v38 = vcombine.high %v2574_v12, %v2582_v37  ;;  %v2583_v19 = vcombine.low %v2558_v10, %v2566_v11  ;;  %v2599_v20 = vcombine.low %v2574_v12, %v2582_v37  ;;  %2904 = vmatprep.subr.mxu1 %v2891_v60  ;;  %v2888_v62 = vld [vmem:[#allocation10 + $0xe0] sm:$0xff]  ;;  %v2887_v63 = vld [vmem:[#allocation10 + $0xd8] sm:$0xff]  ;;  %v2886_v1 = vld [vmem:[#allocation10 + $0xd0] sm:$0xff] }
 0x519   : > { %v2683_v21 = vcombine.low %v2659_v55, %v2675_v15  ;;  %v2685_v25 = vcombine.low %v2666_v13, %v2682_v14  ;;  %v2684_v6 = vcombine.high %v2659_v55, %v2675_v15  ;;  %v2686_v29 = vcombine.high %v2666_v13, %v2682_v14  ;;  %2905 = vmatpush1.msra.mxu1 %v2890_v4  ;;  %v2885_v55 = vld [vmem:[#allocation10 + $0xc8] sm:$0xff]  ;;  %v2884_v15 = vld [vmem:[#allocation10 + $0xc0] sm:$0xff] }
 0x51a   : > { %v2598_v2 = vrot.slane %v2584_v17, %v4374_v9  ;;  %v2614_v22 = vrot.slane %v2600_v38, %v4374_v9  ;;  %v2591_v23 = vrot.slane %v2583_v19, %v4374_v9  ;;  %v2607_v24 = vrot.slane %v2599_v20, %v4374_v9  ;;  %2906 = vmatprep.subr.mxu1 %v2889_v27  ;;  %v2882_v17 = vld [vmem:[#allocation10 + $0xb0] sm:$0xff]  ;;  %v2881_v38 = vld [vmem:[#allocation10 + $0xa8] sm:$0xff]  ;;  %v2880_v19 = vld [vmem:[#allocation10 + $0xa0] sm:$0xff] }
 0x51b   : > { %2907 = vmatpush1.msra.mxu1 %v2888_v62  ;;  %v2879_v20 = vld [vmem:[#allocation10 + $0x98] sm:$0xff]  ;;  %v3030_v60 = vld [vmem:[#allocation11 + $0x68] sm:$0xff]  ;;  %v3045_v4 = vld [vmem:[#allocation11 + $0xe0] sm:$0xff] }
 0x51c   : > { %v2617_v26 = vcombine.low %v2598_v2, %v2614_v22  ;;  %v2616_v5 = vcombine.high %v2591_v23, %v2607_v24  ;;  %v2615_v49 = vcombine.low %v2591_v23, %v2607_v24  ;;  %v2618_v52 = vcombine.high %v2598_v2, %v2614_v22  ;;  %2908 = vmatprep.subr.mxu1 %v2887_v63  ;;  %v2876_v2 = vld [vmem:[#allocation10 + $0x80] sm:$0xff]  ;;  %v2875_v22 = vld [vmem:[#allocation10 + $0x78] sm:$0xff]  ;;  %v2874_v23 = vld [vmem:[#allocation10 + $0x70] sm:$0xff] }
 0x51d   : > { %2909 = vmatpush1.msra.mxu1 %v2886_v1  ;;  %v2873_v24 = vld [vmem:[#allocation10 + $0x68] sm:$0xff]  ;;  %v3029_v27 = vld [vmem:[#allocation11 + $0x60] sm:$0xff]  ;;  %v3044_v62 = vld [vmem:[#allocation11 + $0xd8] sm:$0xff] }
 0x51e   : > { %v3735_v7 = vpack.i.bf16 %v2685_v25, %v2617_v26  ;;  %v3730_v28 = vpack.i.bf16 %v2684_v6, %v2616_v5  ;;  %v3740_v43 = vpack.i.bf16 %v2686_v29, %v2618_v52  ;;  %2910 = vmatprep.subr.mxu1 %v2885_v55  ;;  %v2872_v25 = vld [vmem:[#allocation10 + $0x60] sm:$0xff]  ;;  %v2871_v26 = vld [vmem:[#allocation10 + $0x58] sm:$0xff]  ;;  %v2870_v5 = vld [vmem:[#allocation10 + $0x50] sm:$0xff] }
 0x51f   : > { %2911 = vmatpush1.msra.mxu1 %v2884_v15  ;;  %v2869_v6 = vld [vmem:[#allocation10 + $0x48] sm:$0xff]  ;;  %v2864_v29 = vld [vmem:[#allocation10 + $0x20] sm:$0xff]  ;;  %v3043_v63 = vld [vmem:[#allocation11 + $0xd0] sm:$0xff] }
 0x520   : > { %3736 = vrot.lane.b32.xlu1 %v3735_v7, %s4050_s14  ;;  %3731 = vrot.lane.b32.xlu0 %v3730_v28, %s4052_s9  ;;  %v2867_v7 = vld [vmem:[#allocation10 + $0x38] sm:$0xff]  ;;  %v2866_v28 = vld [vmem:[#allocation10 + $0x30] sm:$0xff]  ;;  %v2865_v52 = vld [vmem:[#allocation10 + $0x28] sm:$0xff]  ;;  %s3390_s14 = sshll.u32 %s4150_s29, 8  ;;  %s4056_s29 = smov [#allocation13]  }
 0x521   : > { %2912 = vmatprep.subr.mxu1 %v2883_v16  ;;  %v3027_v1 = vld [vmem:[#allocation11 + $0x50] sm:$0xff]  ;;  %v3038_v55 = vld [vmem:[#allocation11 + $0xa8] sm:$0xff]  ;;  %v3037_v16 = vld [vmem:[#allocation11 + $0xa0] sm:$0xff]  ;;  %s4718_s7 = scalar_lea.hbm %s4829_s3, %s3390_s14 }
 0x522   : > { %2913 = vmatpush1.msra.mxu1 %v2882_v17  ;;  %v3022_v15 = vld [vmem:[#allocation11 + $0x28] sm:$0xff]  ;;  %v3021_v17 = vld [vmem:[#allocation11 + $0x20] sm:$0xff] }
 0x523   : > { %2914 = vmatprep.subr.mxu1 %v2881_v38  ;;  %v3036_v38 = vld [vmem:[#allocation11 + $0x98] sm:$0xff] }
 0x524   : > { %3741 = vrot.lane.b32.xlu0 %v3740_v43, %s4051_s30  ;;  %2915 = vmatpush1.msra.mxu1 %v2880_v19  ;;  %v2863_v43 = vld [vmem:[#allocation10 + $0x18] sm:$0xff]  ;;  %s550_s30 = scalar_lea.vmem [#allocation13], %s3332_s21  ;;  %s3959_s21 = sshll.u32 %s4056_s29, 4  ;;  %s3960_s21 = int_to_ptr.vmem [resolvable:$false] %s3959_s21 }
 0x525   : > { %2916 = vmatprep.subr.mxu1 %v2879_v20  ;;  %v3020_v19 = vld [vmem:[#allocation11 + $0x18] sm:$0xff]  ;;  %v3035_v20 = vld [vmem:[#allocation11 + $0x90] sm:$0xff]  ;;  %s3189_s9 = sshll.u32 %s550_s30, 4  ;;  %s3961_s20 = scalar_lea.vmem %s3960_s21, 512  ;;  %s4720_s9 = int_to_ptr.vmem [resolvable:$true] %s3189_s9 }
 0x526   : > { %s3955_s23 = scalar_lea.vmem %s4720_s9, 256  ;;  %p3962_p4 = scmp.lt.s32.totalorder %s4720_s9, %s3960_s21 }
 0x527   : > { %p3956_p10 = scmp.ne.s32.totalorder %s4720_s9, %s3955_s23  ;;  %p3963_p0 = scmp.lt.s32.totalorder %s3961_s20, %s3955_s23 }
 0x529   : > { %p3957_p6 = pnand %p3956_p10, %p4830_p1  ;;  %p3964_p3 = por %p3963_p0, %p3962_p4 }
 0x52b   : > { %p3958_p12 = pneg %p3957_p6 }
 0x52d   : > { %p3965_p2 = pnand %p3964_p3, %p3958_p12 }
 0x592   : > { %v3737_v9 = vpop.permute.xlu1 %3736  ;;  %v3732_v44 = vpop.permute.xlu0 %3731 }
 0x593   : > { %v3734_v45 = vunpack.i.h.bf16 %v3732_v44  ;;  %v3733_v30 = vunpack.i.l.bf16 %v3732_v44  ;;  %v3739_v31 = vunpack.i.h.bf16 %v3737_v9  ;;  %v3738_v33 = vunpack.i.l.bf16 %v3737_v9  ;;  %v2862_v9 = vld [vmem:[#allocation10 + $0x10] sm:$0xff]  ;;  %v2861_v44 = vld [vmem:[#allocation10 + $0x8] sm:$0xff] }
 0x595   : > { %v2712_v34 = vsel %vm1630_vm0, %v2683_v21, %v3734_v45  ;;  %v2711_v35 = vsel %vm1630_vm0, %v2615_v49, %v3733_v30  ;;  %v2878_v21 = vld [vmem:[#allocation10 + $0x90] sm:$0xff]  ;;  %v2868_v49 = vld [vmem:[#allocation10 + $0x40] sm:$0xff] }
 0x596   : > { %v3742_v36 = vpop.permute.xlu0 %3741  ;;  %v2714_v51 = vsel %vm2713_vm4, %v2711_v35, %v3738_v33  ;;  %v2715_v53 = vsel %vm2713_vm4, %v2712_v34, %v3739_v31  ;;  %2917 = vmatpush1.msra.mxu1 %v2878_v21  ;;  %v2860_v45 = vld [vmem:[#allocation10] sm:$0xff]  ;;  %v3019_v21 = vld [vmem:[#allocation11 + $0x10] sm:$0xff] }
 0x597   : > { %v3744_v46 = vunpack.i.h.bf16 %v3742_v36  ;;  %v3743_v47 = vunpack.i.l.bf16 %v3742_v36  ;;  %2918 = vmatprep.subr.mxu1 %v2877_v48  ;;  %v3034_v48 = vld [vmem:[#allocation11 + $0x88] sm:$0xff] }
 0x598   : > { %2919 = vmatpush1.msra.mxu1 %v2876_v2  ;;  %v3018_v2 = vld [vmem:[#allocation11 + $0x8] sm:$0xff] }
 0x599   : > { %v2717_v54 = vsel %vm2716_vm5, %v2714_v51, %v3743_v47  ;;  %v2718_v56 = vsel %vm2716_vm5, %v2715_v53, %v3744_v46  ;;  %2920 = vmatprep.subr.mxu1 %v2875_v22  ;;  %v3033_v22 = vld [vmem:[#allocation11 + $0x80] sm:$0xff] }
 0x59a   : > { %3620 = vmatprep.mubr.f32.mxu0 %v2717_v54  ;;  %2921 = vmatpush1.msra.mxu1 %v2874_v23  ;;  %v3379_v54 = vld [vmem:[%s4768_s5] ss:$0 sm:$0xff]  ;;  %v3017_v23 = vld [vmem:[#allocation11] sm:$0xff] }
 0x59b   : > { %3621 = vmatmul.mubr.f32.vlgmr.msra.gmra.mxu0 %v2718_v56  ;;  %2922 = vmatprep.subr.mxu1 %v2873_v24  ;;  %v2892_v24 = vld [vmem:[%s4771_s8] sm:$0x3] }
 0x59c   : > { %2923 = vmatpush1.msra.mxu1 %v2872_v25  ;;  %v2900_v25 = vsub.s32 1, %v4368_v61 }
 0x59d   : > { %2924 = vmatprep.subr.mxu1 %v2871_v26  ;;  %v2897_v26 = vrot.slane %v2892_v24, %v1991_v40 }
 0x59e   : > { %2925 = vmatpush1.msra.mxu1 %v2870_v5  ;;  %v2901_v5 = vrot.slane %v2892_v24, %v2900_v25 }
 0x59f   : > { %2926 = vmatprep.subr.mxu1 %v2869_v6 }
 0x5a0   : > { %2927 = vmatpush1.msra.mxu1 %v2868_v49 }
 0x5a1   : > { %2928 = vmatprep.subr.mxu1 %v2867_v7 }
 0x5a2   : > { %2929 = vmatpush1.msra.mxu1 %v2866_v28 }
 0x5a3   : > { %2930 = vmatprep.subr.mxu1 %v2865_v52 }
 0x5a4   : > { %2931 = vmatpush1.msra.mxu1 %v2864_v29 }
 0x5a5   : > { %2932 = vmatprep.subr.mxu1 %v2863_v43 }
 0x5a6   : > { %2933 = vmatpush1.msra.mxu1 %v2862_v9 }
 0x5a7   : > { %2934 = vmatprep.subr.mxu1 %v2861_v44 }
 0x5a8   : > { %2935 = vmatpush1.msra.mxu1 %v2860_v45 }
 0x65b   : > { %v3622_v32 = vpop.f32.mrf.mxu0 }
 0x65c   : > { %v2814_v50 = vadd.f32 %v3622_v32, %v3378_v57 }
 0x65d   : > { %v2808_v58 = vpop.f32.mrf.mxu0 }
 0x65e   : > { %v2809_v18 = vadd.f32 %v3378_v57, %v2808_v58  ;;  %v2818_v42 = vadd.f32 %v3793_v59, %v2814_v50  ;;  %v3380_v57 = vld [vmem:[%s4769_s6] ss:$0 sm:$0xff] }
 0x65f   : > { %v3032_v59 = vld [vmem:[#allocation11 + $0x78] sm:$0xff] }
 0x660   : > { %2823 = vadd.xlane.f32.xlu0 %v2818_v42  ;;  %v2817_v41 = vadd.f32 %v3794_v39, %v2809_v18  ;;  %v3048_v18 = vld [vmem:[#allocation11 + $0xf8] sm:$0xff]  ;;  %v3031_v39 = vld [vmem:[#allocation11 + $0x70] sm:$0xff] }
 0x661   : > { %3459 = vmatprep.subr.mxu0 %v3048_v18 }
 0x662   : > { %2821 = vadd.xlane.f32.xlu1 %v2817_v41  ;;  %3460 = vmatpush3.msra.mxu0 %v3032_v59 }
 0x6e9   : > { %v2824_v3 = vpop.xlane.xlu0 %2823 }
 0x6ea   : > { %v2827_v8 = vmul.f32 0.0078125, %v2824_v3  ;;  %v3042_v3 = vld [vmem:[#allocation11 + $0xc8] sm:$0xff] }
 0x6eb   : > { %v2822_v10 = vpop.xlane.xlu1 %2821 }
 0x6ec   : > { %v4672_v11 = vsub.f32 %v2818_v42, %v2827_v8  ;;  %v2826_v12 = vmul.f32 0.0078125, %v2822_v10  ;;  %v3047_v42 = vld [vmem:[#allocation11 + $0xf0] sm:$0xff]  ;;  %v3026_v8 = vld [vmem:[#allocation11 + $0x48] sm:$0xff]  ;;  %v3041_v10 = vld [vmem:[#allocation11 + $0xc0] sm:$0xff] }
 0x6ed   : > { %3461 = vmatprep.subr.mxu0 %v3047_v42 }
 0x6ee   : > { %v4674_v37 = vsub.f32 %v2817_v41, %v2826_v12  ;;  %v2831_v13 = vmul.f32 %v4672_v11, %v4672_v11  ;;  %v3046_v41 = vld [vmem:[#allocation11 + $0xe8] sm:$0xff]  ;;  %3462 = vmatpush3.msra.mxu0 %v3031_v39  ;;  %v3040_v12 = vld [vmem:[#allocation11 + $0xb8] sm:$0xff] }
 0x6ef   : > { %3463 = vmatprep.subr.mxu0 %v3046_v41 }
 0x6f0   : > { %2834 = vadd.xlane.f32.xlu1 %v2831_v13  ;;  %v2830_v14 = vmul.f32 %v4674_v37, %v4674_v37  ;;  %3464 = vmatpush3.msra.mxu0 %v3030_v60  ;;  %v3039_v13 = vld [vmem:[#allocation11 + $0xb0] sm:$0xff] }
 0x6f1   : > { %3465 = vmatprep.subr.mxu0 %v3045_v4 }
 0x6f2   : > { %2832 = vadd.xlane.f32.xlu0 %v2830_v14  ;;  %3466 = vmatpush3.msra.mxu0 %v3029_v27  ;;  %v3023_v14 = vld [vmem:[#allocation11 + $0x30] sm:$0xff] }
 0x6f3   : > { %3467 = vmatprep.subr.mxu0 %v3044_v62 }
 0x779   : > { %v2835_v30 = vpop.xlane.xlu1 %2834 }
 0x77a   : > { %v2837_v31 = vmul.f32 0.0078125, %v2835_v30 }
 0x77b   : > { %v2833_v33 = vpop.xlane.xlu0 %2832 }
 0x77c   : > { %v2839_v34 = vadd.f32 1e-05, %v2837_v31  ;;  %v2836_v35 = vmul.f32 0.0078125, %v2833_v33 }
 0x77e   : > { %3777 = vrsqrt.f32 %v2839_v34  ;;  %v2838_v36 = vadd.f32 1e-05, %v2836_v35 }
 0x780   : > { %3779 = vrsqrt.f32 %v2838_v36 }
 0x78b   : > { %v3778_v46 = vpop.eup %3777 }
 0x78c   : > { %v2843_v53 = vmul.f32 %v3778_v46, %v4672_v11  ;;  %v3025_v11 = vld [vmem:[#allocation11 + $0x40] sm:$0xff] }
 0x78d   : > { %v3780_v47 = vpop.eup %3779 }
 0x78e   : > { %v2842_v51 = vmul.f32 %v3780_v47, %v4674_v37  ;;  %v2851_v50 = vmul.f32 %v3379_v54, %v2843_v53  ;;  %v3024_v37 = vld [vmem:[#allocation11 + $0x38] sm:$0xff] }
 0x790   : > { %v2850_v56 = vmul.f32 %v3379_v54, %v2842_v51  ;;  %v4692_v58 = vadd.f32 %v3380_v57, %v2851_v50 }
 0x792   : > { %v4688_v32 = vadd.f32 %v3380_v57, %v2850_v56 }
 0x794   : > { %2969 = vmatmul.mubr.f32.vlgmr.msra.gmra.mxu1 %v4688_v32 }
 0x795   : > { %2974 = vmatprep.mubr.f32.mxu1 %v4049_v0  ;;  %v3028_v0 = vld [vmem:[#allocation11 + $0x58] sm:$0xff] }
 0x796   : > { %3468 = vmatpush3.msra.mxu0 %v3028_v0 }
 0x797   : > { %3469 = vmatprep.subr.mxu0 %v3043_v63 }
 0x798   : > { %2975 = vmatmul.mubr.f32.gmra.mxu1 %v4692_v58  ;;  %3470 = vmatpush3.msra.mxu0 %v3027_v1 }
 0x799   : > { %3471 = vmatprep.subr.mxu0 %v3042_v3 }
 0x79a   : > { %3472 = vmatpush3.msra.mxu0 %v3026_v8 }
 0x79b   : > { %3473 = vmatprep.subr.mxu0 %v3041_v10 }
 0x79c   : > { %3474 = vmatpush3.msra.mxu0 %v3025_v11 }
 0x79d   : > { %3475 = vmatprep.subr.mxu0 %v3040_v12 }
 0x79e   : > { %3476 = vmatpush3.msra.mxu0 %v3024_v37 }
 0x79f   : > { %3477 = vmatprep.subr.mxu0 %v3039_v13 }
 0x7a0   : > { %3478 = vmatpush3.msra.mxu0 %v3023_v14  ;;  %v3381_v14 = vld [vmem:[%s4773_s10] ss:$0 sm:$0xff] }
 0x7a1   : > { %3479 = vmatprep.subr.mxu0 %v3038_v55 }
 0x7a2   : > { %3480 = vmatpush3.msra.mxu0 %v3022_v15 }
 0x7a3   : > { %3481 = vmatprep.subr.mxu0 %v3037_v16 }
 0x7a4   : > { %3482 = vmatpush3.msra.mxu0 %v3021_v17 }
 0x7a5   : > { %3483 = vmatprep.subr.mxu0 %v3036_v38 }
 0x7a6   : > { %3484 = vmatpush3.msra.mxu0 %v3020_v19 }
 0x7a7   : > { %3485 = vmatprep.subr.mxu0 %v3035_v20 }
 0x7a8   : > { %3486 = vmatpush3.msra.mxu0 %v3019_v21 }
 0x7a9   : > { %3487 = vmatprep.subr.mxu0 %v3034_v48 }
 0x7aa   : > { %3488 = vmatpush3.msra.mxu0 %v3018_v2 }
 0x7ab   : > { %3489 = vmatprep.subr.mxu0 %v3033_v22 }
 0x7ac   : > { %3490 = vmatpush3.msra.mxu0 %v3017_v23 }
 0x854   : > { %v2970_v6 = vpop.f32.mrf.mxu1 }
 0x855   : > { %v2971_v49 = vadd.f32 %v2970_v6, %v2897_v26 }
 0x856   : > { %v2972_v7 = vpop.f32.mrf.mxu1 }
 0x857   : > { %v2985_v28 = vmul.f32 0.044715, %v2971_v49  ;;  %v2973_v52 = vadd.f32 %v2972_v7, %v2901_v5  ;;  %v2981_v62 = vmul.f32 0.5, %v2971_v49 }
 0x858   : > { %v2976_v29 = vpop.f32.mrf.mxu1 }
 0x859   : > { %v2989_v43 = vmul.f32 %v2985_v28, %v2971_v49  ;;  %v2986_v9 = vmul.f32 0.044715, %v2973_v52  ;;  %v2977_v44 = vadd.f32 %v2976_v29, %v2897_v26  ;;  %v2982_v60 = vmul.f32 0.5, %v2973_v52 }
 0x85a   : > { %v2978_v45 = vpop.f32.mrf.mxu1 }
 0x85b   : > { %v2993_v30 = vmul.f32 %v2989_v43, %v2971_v49  ;;  %v2990_v31 = vmul.f32 %v2986_v9, %v2973_v52  ;;  %v2987_v33 = vmul.f32 0.044715, %v2977_v44  ;;  %v2979_v34 = vadd.f32 %v2978_v45, %v2901_v5  ;;  %v3382_v43 = vld [vmem:[%s4774_s11] ss:$0 sm:$0xff] }
 0x85c   : > { %v2983_v11 = vmul.f32 0.5, %v2977_v44 }
 0x85d   : > { %v2997_v35 = vadd.f32 %v2993_v30, %v2971_v49  ;;  %v2991_v36 = vmul.f32 %v2987_v33, %v2977_v44  ;;  %v2988_v46 = vmul.f32 0.044715, %v2979_v34  ;;  %v2994_v61 = vmul.f32 %v2990_v31, %v2973_v52 }
 0x85e   : > { %v2984_v8 = vmul.f32 0.5, %v2979_v34 }
 0x85f   : > { %v2992_v40 = vmul.f32 %v2988_v46, %v2979_v34  ;;  %v2998_v47 = vadd.f32 %v2994_v61, %v2973_v52  ;;  %v3001_v51 = vmul.f32 0.7978846, %v2997_v35  ;;  %v2995_v53 = vmul.f32 %v2991_v36, %v2977_v44 }
 0x861   : > { %v3002_v54 = vmul.f32 0.7978846, %v2998_v47  ;;  %3781 = vtanh.f32 %v3001_v51  ;;  %v2996_v56 = vmul.f32 %v2992_v40, %v2979_v34  ;;  %v2999_v57 = vadd.f32 %v2995_v53, %v2977_v44  ;;  %v3383_v44 = vld [vmem:[%s4775_s12] ss:$0 sm:$0xff] }
 0x863   : > { %3783 = vtanh.f32 %v3002_v54  ;;  %v3000_v50 = vadd.f32 %v2996_v56, %v2979_v34  ;;  %v3003_v18 = vmul.f32 0.7978846, %v2999_v57 }
 0x865   : > { %v3004_v59 = vmul.f32 0.7978846, %v3000_v50  ;;  %3785 = vtanh.f32 %v3003_v18 }
 0x867   : > { %3787 = vtanh.f32 %v3004_v59 }
 0x86e   : > { %v3782_v42 = vpop.eup %3781 }
 0x86f   : > { %v3009_v41 = vadd.f32 1.0, %v3782_v42 }
 0x870   : > { %v3784_v39 = vpop.eup %3783 }
 0x871   : > { %v3010_v4 = vadd.f32 1.0, %v3784_v39  ;;  %v3013_v1 = vmul.f32 %v3009_v41, %v2981_v62 }
 0x872   : > { %v3786_v27 = vpop.eup %3785 }
 0x873   : > { %v3014_v0 = vmul.f32 %v3010_v4, %v2982_v60  ;;  %v3011_v3 = vadd.f32 1.0, %v3786_v27 }
 0x874   : > { %v3788_v63 = vpop.eup %3787 }
 0x875   : > { %3120 = vmatprep.mubr.f32.mxu0 %v3014_v0  ;;  %v3012_v10 = vadd.f32 1.0, %v3788_v63  ;;  %v3015_v37 = vmul.f32 %v3011_v3, %v2983_v11 }
 0x876   : > { %3121 = vmatmul.mubr.f32.vlgmr.msra.gmra.mxu0 %v3013_v1 }
 0x877   : > { %v3016_v12 = vmul.f32 %v3012_v10, %v2984_v8 }
 0x879   : > { %3125 = vmatprep.mubr.f32.mxu0 %v3016_v12 }
 0x87a   : > { %3126 = vmatmul.mubr.f32.gmra.mxu0 %v3015_v37 }
 0x936   : > { %v3491_v13 = vpop.f32.mrf.mxu0 }
 0x938   : > { %v3492_v55 = vpop.f32.mrf.mxu0 }
 0x939   : > { %v3493_v15 = vadd.f32 %v3492_v55, %v3491_v13 }
 0x93a   : > { %v3494_v16 = vpop.f32.mrf.mxu0 }
 0x93b   : > { %v3123_v17 = vadd.f32 %v3493_v15, %v3381_v14 }
 0x93c   : > { %v3495_v38 = vpop.f32.mrf.mxu0 }
 0x93d   : > { %v3496_v19 = vadd.f32 %v3495_v38, %v3494_v16  ;;  %v3131_v20 = vadd.f32 %v3123_v17, %v4688_v32 }
 0x93f   : > { %v3128_v21 = vadd.f32 %v3496_v19, %v3381_v14  ;;  %3135 = vadd.xlane.f32.xlu0 %v3131_v20 }
 0x941   : > { %v3132_v48 = vadd.f32 %v3128_v21, %v4692_v58 }
 0x943   : > { %3137 = vadd.xlane.f32.xlu1 %v3132_v48 }
 0x9c8   : > { %v3136_v2 = vpop.xlane.xlu0 %3135 }
 0x9c9   : > { %v3139_v22 = vmul.f32 0.0078125, %v3136_v2 }
 0x9cb   : > { %v3141_v23 = vsub.f32 %v3131_v20, %v3139_v22 }
 0x9cc   : > { %v3138_v24 = vpop.xlane.xlu1 %3137 }
 0x9cd   : > { %v3140_v25 = vmul.f32 0.0078125, %v3138_v24  ;;  %v3143_v26 = vmul.f32 %v3141_v23, %v3141_v23 }
 0x9cf   : > { %v3142_v5 = vsub.f32 %v3132_v48, %v3140_v25  ;;  %3145 = vadd.xlane.f32.xlu0 %v3143_v26 }
 0x9d1   : > { %v3144_v6 = vmul.f32 %v3142_v5, %v3142_v5 }
 0x9d3   : > { %3147 = vadd.xlane.f32.xlu1 %v3144_v6 }
 0xa58   : > { %v3146_v49 = vpop.xlane.xlu0 %3145 }
 0xa59   : > { %v3149_v7 = vmul.f32 0.0078125, %v3146_v49 }
 0xa5b   : > { %v3151_v32 = vadd.f32 1e-05, %v3149_v7 }
 0xa5c   : > { %v3148_v28 = vpop.xlane.xlu1 %3147 }
 0xa5d   : > { %3789 = vrsqrt.f32 %v3151_v32  ;;  %v3150_v52 = vmul.f32 0.0078125, %v3148_v28 }
 0xa5f   : > { %v3152_v58 = vadd.f32 1e-05, %v3150_v52 }
 0xa61   : > { %3791 = vrsqrt.f32 %v3152_v58 }
 0xa6a   : > { %v3790_v29 = vpop.eup %3789 }
 0xa6b   : > { %v3155_v9 = vmul.f32 %v3790_v29, %v3141_v23 }
 0xa6d   : > { %v3163_v45 = vmul.f32 %v3382_v43, %v3155_v9 }
 0xa6e   : > { %v3792_v30 = vpop.eup %3791 }
 0xa6f   : > { %v3171_v31 = vadd.f32 %v3383_v44, %v3163_v45  ;;  %v3156_v33 = vmul.f32 %v3792_v30, %v3142_v5 }
 0xa71   : > { %v3164_v34 = vmul.f32 %v3382_v43, %v3156_v33  ;;  %3173 = vst [vmem:[%s550_s30] sm:$0xff] %v3171_v31 }
 0xa73   : > { %v3172_v35 = vadd.f32 %v3383_v44, %v3164_v34 }
 0xa75   : > { %3174 = vst [vmem:[%s550_s30 + $0x8] sm:$0xff] %v3172_v35 }
 0xa76   : > { %3968 = shalt.err (!%p3965_p2)
}
 0xa77   : > { %s3969_s0 = scalar_lea.hbm %s4718_s7, 256  ;;  %s3973_s24 = scalar_lea.hbm %s4829_s3, 512 }
 0xa78   : > { %p3970_p8 = scmp.ne.s32.totalorder %s4718_s7, %s3969_s0  ;;  %p3974_p9 = scmp.lt.s32.totalorder %s4718_s7, %s4829_s3 }
 0xa79   : > { %p3975_p13 = scmp.lt.s32.totalorder %s3973_s24, %s3969_s0 }
 0xa7a   : > { %p3971_p11 = pnand %p3970_p8, %p4830_p1 }
 0xa7b   : > { %p3976_p5 = por %p3975_p13, %p3974_p9 }
 0xa7c   : > { %p3972_p7 = pneg %p3971_p11 }
 0xa7e   : > { %p3977_p10 = pnand %p3976_p5, %p3972_p7 }
 0xa80   : > { %3980 = shalt.err (!%p3977_p10)
}
 0xa81   : > { %s4057_s22 = smov 128   ;;  %s4058_s14 = smov 8  }
 0xa82   : > { %3643 = dma.vmem_to_hbm [thread:$0]  (%p4830_p1), %s4720_s9, 256, %s4718_s7, %s3176_s17, %s4057_s22, %s4057_s22, %s4058_s14  }
 0xa83 PF: > { %s4831_s30 = sld [smem:[#allocation20_spill]]  ;;  %p4834_p12 = scmp.ge.s32.totalorder %s4035_s28, 2 }
 0xa84   : > { %s4832_s18 = sld [smem:[#allocation22_spill]] }
 0xa89   : > { %s3204_s15 = sand.u32 1, %s4831_s30  }
 0xa8a   : > { %p4833_p6 = scmp.ne.s32.totalorder %s4832_s18, 0  ;;  %s3205_s23 = scalar_lea.sflag [#allocation4], %s3204_s15 }
 0xa8c   : > { %p3666_p4 = pnand %p4834_p12, %p4833_p6 }
 0xa8e   : > { %p3667_p0 = pneg %p3666_p4 }
 0xa90   : > { %4018 = dma.done.wait (%p3667_p0), %s3205_s23, 256  }
 0xa91   : > { %4020 = vsyncadd (%p3667_p0), %s3205_s23, 4294967040  ;;  %s4835_s28 = sld [smem:[#allocation23_spill]]  ;;  %s4838_s25 = smov %s4027_s26 }
 0xa92   : > { %s4836_s29 = sld [smem:[#allocation21_spill]] }
 0xa93   : > { %s4837_s27 = sld [smem:[#allocation25_spill]] }
 0xa97   : > { %p31_p3 = scmp.ge.s32.totalorder %s4835_s28, 4  }
 0xa98   : > { %s4839_s26 = smov %s4836_s29 }
 0xa99   :  { %33 = sbr.rel (!%p31_p3) target bundleno = 16 (0x10), region = 146 }
 0xa9e   :  { %3210 = vsyncpa [#allocation3], 1 }
 0xa9f   :  { %3212 = vsyncpa [#allocation3 + $0x1], 1 }
 0xaa0   :  { %3213 = vsyncpa [#allocation6], 1 }
 0xaa1   :  { %3215 = vsyncpa [#allocation6 + $0x1], 1 }
 0xaa2   :  { %3216 = vsyncpa [#allocation9], 1 }
 0xaa3   :  { %3217 = vsyncpa [#allocation12], 1 }
 0xaa4   :  { %3218 = vsyncpa [#allocation4], 1 }
 0xaa5   :  { %3220 = vsyncpa [#allocation4 + $0x1], 1 }

</bundles_post_ra>
